<compile_context>
chip_gen: v7x
topology: tpu7x:2x2x1
jax: 0.10.0
libtpu: 0.0.40
codegen_flags: <defaults>
</compile_context>

<pallas_src>
import math
import functools

import jax
import jax.numpy as jnp
from jax.experimental import pallas as pl
from jax.experimental.pallas import tpu as pltpu


PARAM_DTYPE = jnp.bfloat16         # bf16 storage/matmuls, f32 accumulation+stats
LN_EPS = 1e-5                      # PyTorch nn.LayerNorm default


def _vmem_limit_bytes():
    """Generation-aware scoped-VMEM limit (≈3/4 of physical, capped at 96 MiB)."""
    try:
        info = pltpu.get_tpu_info()
        cap = getattr(info, "vmem_capacity_bytes", None)
        if cap:
            return int(min(cap * 3 // 4, 96 * 1024 * 1024))
    except Exception:
        pass
    return 32 * 1024 * 1024


VMEM_LIMIT = _vmem_limit_bytes()


# --------------------------------------------------------------------------
# Fused transformer stack: ONE pallas_call, grid over the layer axis.
# --------------------------------------------------------------------------

def _layernorm(x, g, b, eps):
    # Biased variance + eps inside rsqrt, matching torch.nn.LayerNorm (f32).
    mean = jnp.mean(x, axis=-1, keepdims=True)
    var = jnp.mean(jnp.square(x - mean), axis=-1, keepdims=True)
    return (x - mean) * jax.lax.rsqrt(var + eps) * g + b


def _stack_kernel(x_emb_ref, pe_ref, wqkv_ref, bqkv_ref, wo_ref, bo_ref,
                  ln1g_ref, ln1b_ref, w1_ref, b1_ref, w2_ref, b2_ref,
                  ln2g_ref, ln2b_ref, o_ref, x_scr, attn_scr,
                  *, num_heads, eps, emb_scale):
    layer = pl.program_id(0)
    B, S, D = x_scr.shape
    dk = D // num_heads
    scale = 1.0 / math.sqrt(dk)
    cdt = wqkv_ref.dtype                      # compute dtype for MXU operands

    @pl.when(layer == 0)
    def _():
        # embedding * sqrt(d_model) + positional encoding (dropout = identity).
        x_scr[...] = (x_emb_ref[...].astype(jnp.float32) * emb_scale
                      + pe_ref[...].astype(jnp.float32)[None, :, :])

    wqkv = wqkv_ref[...]
    bqkv = bqkv_ref[...].astype(jnp.float32)
    wo = wo_ref[...]
    bo = bo_ref[...].astype(jnp.float32)
    ln1g = ln1g_ref[...].astype(jnp.float32)
    ln1b = ln1b_ref[...].astype(jnp.float32)
    w1 = w1_ref[...]
    b1 = b1_ref[...].astype(jnp.float32)
    w2 = w2_ref[...]
    b2 = b2_ref[...].astype(jnp.float32)
    ln2g = ln2g_ref[...].astype(jnp.float32)
    ln2b = ln2b_ref[...].astype(jnp.float32)

    for b in range(B):                         # B is small; unrolled
        x = x_scr[b]                           # (S, D) f32, VMEM-resident

        # ---- fused QKV projection: one wide (D, 3D) bf16 matmul, f32 acc ----
        qkv = (jnp.dot(x.astype(cdt), wqkv, preferred_element_type=jnp.float32)
               + bqkv)                         # (S, 3D) f32
        q = (qkv[:, 0 * D:1 * D] * scale).astype(cdt)   # fold 1/sqrt(dk) into Q
        k = qkv[:, 1 * D:2 * D].astype(cdt)
        v = qkv[:, 2 * D:3 * D].astype(cdt)

        # ---- per-head attention; head outputs land in a VMEM scratch so the
        #      output projection below is ONE full-depth (S,D)@(D,D) matmul.
        #      (With dk < 128 the head slices are lane-narrow; at realistic
        #       d_model process groups of 128//dk heads per 128-lane slab.)
        for h in range(num_heads):
            qh = q[:, h * dk:(h + 1) * dk]
            kh = k[:, h * dk:(h + 1) * dk]
            vh = v[:, h * dk:(h + 1) * dk]
            s = jax.lax.dot_general(qh, kh, (((1,), (1,)), ((), ())),
                                    preferred_element_type=jnp.float32)  # (S,S)
            p = jnp.exp(s - jnp.max(s, axis=-1, keepdims=True))
            p = p / jnp.sum(p, axis=-1, keepdims=True)   # exact softmax (f32)
            attn_scr[:, h * dk:(h + 1) * dk] = jnp.dot(
                p.astype(cdt), vh, preferred_element_type=jnp.float32)

        proj = (jnp.dot(attn_scr[...].astype(cdt), wo,
                        preferred_element_type=jnp.float32) + bo)

        # ---- residual + LayerNorm1 (f32 stats) ----
        y = _layernorm(x + proj, ln1g, ln1b, eps)

        # ---- FFN: Linear -> ReLU -> Linear, + residual + LayerNorm2 ----
        h1 = jnp.maximum(
            jnp.dot(y.astype(cdt), w1, preferred_element_type=jnp.float32) + b1,
            0.0)
        ff = jnp.dot(h1.astype(cdt), w2, preferred_element_type=jnp.float32) + b2
        x_scr[b] = _layernorm(y + ff, ln2g, ln2b, eps)

    @pl.when(layer == pl.num_programs(0) - 1)
    def _():
        o_ref[...] = x_scr[...].astype(o_ref.dtype)


def transformer_stack(x_emb, pe, stack, *, num_heads, eps=LN_EPS):
    # x_emb: (B, S, D) embedding-gather result; pe: (S, D).
    # Grid over the layer axis; per-layer weight slabs are pipelined
    # (next layer's weights prefetched while the current layer computes).
    # TODO(synk): at realistic B/S add a (batch or seq-tile) grid axis so
    # v7x's two TensorCores both get work and DMA overlaps compute better.
    B, S, D = x_emb.shape
    L = stack["wqkv"].shape[0]

    names = ("wqkv", "bqkv", "wo", "bo", "ln1_g", "ln1_b",
             "w1", "b1", "w2", "b2", "ln2_g", "ln2_b")
    operands = [x_emb, pe]
    in_specs = [pl.BlockSpec((B, S, D), lambda l: (0, 0, 0)),
                pl.BlockSpec((S, D), lambda l: (0, 0))]
    for name in names:
        arr = stack[name]                      # (L, r, c)
        operands.append(arr)
        in_specs.append(
            pl.BlockSpec((None,) + tuple(arr.shape[1:]), lambda l: (l, 0, 0)))

    kernel = functools.partial(_stack_kernel, num_heads=num_heads, eps=eps,
                               emb_scale=math.sqrt(D))
    return pl.pallas_call(
        kernel,
        out_shape=jax.ShapeDtypeStruct((B, S, D), x_emb.dtype),
        grid=(L,),
        in_specs=in_specs,
        out_specs=pl.BlockSpec((B, S, D), lambda l: (0, 0, 0)),
        scratch_shapes=[pltpu.VMEM((B, S, D), jnp.float32),   # running activation
                        pltpu.VMEM((S, D), jnp.float32)],     # per-batch attn out
        compiler_params=pltpu.CompilerParams(
            dimension_semantics=("arbitrary",),
            vmem_limit_bytes=VMEM_LIMIT),
    )(*operands)


# --------------------------------------------------------------------------
# Final logits projection: single M row-block, lane-dense vocab tiles.
# --------------------------------------------------------------------------

def _matmul_bias_kernel(x_ref, w_ref, b_ref, o_ref):
    acc = jnp.dot(x_ref[...], w_ref[...], preferred_element_type=jnp.float32)
    o_ref[...] = (acc + b_ref[...].astype(jnp.float32)).astype(o_ref.dtype)


def linear_logits(x, w, b):
    # x: (M, K) bf16, w: (K, N) bf16 with N padded to a multiple of 128.
    # All of M stays in one block so W streams from HBM exactly once; the
    # padded vocab axis is tiled lane-dense and marked "parallel".
    M, K = x.shape
    N = w.shape[1]
    tn = N
    for cand in (2048, 1024, 512, 256, 128):
        if N % cand == 0:
            tn = cand
            break
    return pl.pallas_call(
        _matmul_bias_kernel,
        out_shape=jax.ShapeDtypeStruct((M, N), jnp.float32),
        grid=(N // tn,),
        in_specs=[pl.BlockSpec((M, K), lambda j: (0, 0)),
                  pl.BlockSpec((K, tn), lambda j: (0, j)),
                  pl.BlockSpec((1, tn), lambda j: (0, j))],
        out_specs=pl.BlockSpec((M, tn), lambda j: (0, j)),
        compiler_params=pltpu.CompilerParams(
            dimension_semantics=("parallel",),
            vmem_limit_bytes=VMEM_LIMIT),
    )(x, w, b)


# ----------------------------- parameter init -----------------------------

def _xavier_uniform(key, fan_in, fan_out):
    a = math.sqrt(6.0 / (fan_in + fan_out))
    # Stored (in, out) so kernels compute x @ W; same distribution as
    # PyTorch's xavier_uniform_ on the (out, in) weight.
    return jax.random.uniform(key, (fan_in, fan_out), jnp.float32,
                              -a, a).astype(PARAM_DTYPE)


def make_positional_encoding(max_len, d_model):
    position = jnp.arange(max_len, dtype=jnp.float32)[:, None]
    div_term = jnp.exp(jnp.arange(0, d_model, 2, dtype=jnp.float32)
                       * (-math.log(10000.0) / d_model))
    pe = jnp.zeros((max_len, d_model), jnp.float32)
    pe = pe.at[:, 0::2].set(jnp.sin(position * div_term))
    pe = pe.at[:, 1::2].set(jnp.cos(position * div_term))
    return pe.astype(PARAM_DTYPE)


def init_params(key, vocab_size, d_model, num_layers, num_heads, d_ff, max_len):
    keys = jax.random.split(key, 2 + num_layers)
    emb = (0.02 * jax.random.normal(keys[0], (vocab_size, d_model),
                                    jnp.float32)).astype(PARAM_DTYPE)
    pe = make_positional_encoding(max_len, d_model)

    def layer_params(k):
        ks = jax.random.split(k, 6)
        wq = _xavier_uniform(ks[0], d_model, d_model)
        wk = _xavier_uniform(ks[1], d_model, d_model)
        wv = _xavier_uniform(ks[2], d_model, d_model)
        return {
            "wqkv": jnp.concatenate([wq, wk, wv], axis=1),   # fused (D, 3D)
            "bqkv": jnp.zeros((1, 3 * d_model), PARAM_DTYPE),
            "wo": _xavier_uniform(ks[3], d_model, d_model),
            "bo": jnp.zeros((1, d_model), PARAM_DTYPE),
            "ln1_g": jnp.ones((1, d_model), PARAM_DTYPE),
            "ln1_b": jnp.zeros((1, d_model), PARAM_DTYPE),
            "w1": _xavier_uniform(ks[4], d_model, d_ff),
            "b1": jnp.zeros((1, d_ff), PARAM_DTYPE),
            "w2": _xavier_uniform(ks[5], d_ff, d_model),
            "b2": jnp.zeros((1, d_model), PARAM_DTYPE),
            "ln2_g": jnp.ones((1, d_model), PARAM_DTYPE),
            "ln2_b": jnp.zeros((1, d_model), PARAM_DTYPE),
        }

    layers = [layer_params(keys[2 + l]) for l in range(num_layers)]
    stack = {name: jnp.stack([lp[name] for lp in layers], axis=0)
             for name in layers[0]}

    # Pad the vocab axis to a multiple of 128 so logits stores are lane-dense.
    vocab_pad = ((vocab_size + 127) // 128) * 128
    w_out = _xavier_uniform(keys[1], d_model, vocab_size)
    w_out = jnp.pad(w_out, ((0, 0), (0, vocab_pad - vocab_size)))
    b_out = jnp.zeros((1, vocab_pad), PARAM_DTYPE)

    return {"embedding": emb, "pe": pe, "stack": stack,
            "w_out": w_out, "b_out": b_out}


# ------------------------------- forward pass ------------------------------

def transformer_forward(params, tokens, *, num_heads, vocab_size):
    B, S = tokens.shape
    d_model = params["embedding"].shape[1]

    # Embedding gather stays in XLA (data-dependent row gather); the sqrt(d)
    # scale and positional-encoding add are fused into the stack kernel.
    # TODO(synk): a scalar-prefetch row-gather kernel could fold this gather in.
    x_emb = jnp.take(params["embedding"], tokens, axis=0)        # (B, S, D)

    x = transformer_stack(x_emb, params["pe"][:S], params["stack"],
                          num_heads=num_heads)                    # (B, S, D)

    logits = linear_logits(x.reshape(B * S, d_model),
                           params["w_out"], params["b_out"])      # (B*S, Vpad)
    return logits[:, :vocab_size].reshape(B, S, vocab_size)


# ---------------------------------- main -----------------------------------

if __name__ == "__main__":
    vocab_size = 32
    d_model = 32
    num_layers = 2
    num_heads = 4
    d_ff = 64
    max_len = 64
    batch, seq = 2, 8

    key = jax.random.PRNGKey(0)
    pkey, dkey = jax.random.split(key)
    params = init_params(pkey, vocab_size, d_model, num_layers, num_heads,
                         d_ff, max_len)
    tokens = jax.random.randint(dkey, (batch, seq), 0, vocab_size,
                                dtype=jnp.int32)

    fwd = jax.jit(functools.partial(transformer_forward,
                                    num_heads=num_heads,
                                    vocab_size=vocab_size))
    logits = fwd(params, tokens)
    jax.block_until_ready(logits)
    assert logits.shape == (batch, seq, vocab_size)
    assert bool(jnp.all(jnp.isfinite(logits.astype(jnp.float32))))
    print("KERNEL_OK")
</pallas_src>

<mosaic_0001>
module attributes {stable_mosaic.version = 11 : i64} {
  func.func @_matmul_bias_kernel(%arg0: i32, %arg1: memref<16x32xbf16, #tpu.memory_space<vmem>>, %arg2: memref<32x128xbf16, #tpu.memory_space<vmem>>, %arg3: memref<1x128xbf16, #tpu.memory_space<vmem>>, %arg4: memref<16x128xf32, #tpu.memory_space<vmem>>) attributes {dimension_semantics = [#tpu.dimension_semantics<parallel>], iteration_bounds = array<i64: 1>, scalar_prefetch = 0 : i64, scratch_operands = 0 : i64, tpu.core_type = #tpu.core_type<tc>, window_params = [{pipeline_mode = #tpu.pipeline_mode<synchronous>, transform_indices = @transform_0, window_bounds = array<i64: 16, 32>}, {transform_indices = @transform_1, window_bounds = array<i64: 32, 128>}, {transform_indices = @transform_2, window_bounds = array<i64: 1, 128>}, {transform_indices = @transform_3, window_bounds = array<i64: 16, 128>}]} {
    %c0 = arith.constant 0 : index
    %c0_0 = arith.constant 0 : index
    %0 = vector.load %arg1[%c0, %c0_0] : memref<16x32xbf16, #tpu.memory_space<vmem>>, vector<16x32xbf16>
    %c0_1 = arith.constant 0 : index
    %c0_2 = arith.constant 0 : index
    %1 = vector.load %arg2[%c0_1, %c0_2] : memref<32x128xbf16, #tpu.memory_space<vmem>>, vector<32x128xbf16>
    %cst = arith.constant dense<0.000000e+00> : vector<16x128xf32>
    %2 = tpu.matmul %0, %1, %cst {dimension_numbers = #tpu.dot_dimension_numbers<[1], [0], [0], [1], [0, 0, 1, 1], [], []>} : vector<16x32xbf16>, vector<32x128xbf16>, vector<16x128xf32> -> vector<16x128xf32>
    %c0_3 = arith.constant 0 : index
    %c0_4 = arith.constant 0 : index
    %3 = vector.load %arg3[%c0_3, %c0_4] : memref<1x128xbf16, #tpu.memory_space<vmem>>, vector<1x128xbf16>
    %4 = arith.extf %3 : vector<1x128xbf16> to vector<1x128xf32>
    %5 = vector.broadcast %4 : vector<1x128xf32> to vector<16x128xf32>
    %6 = arith.addf %2, %5 : vector<16x128xf32>
    %c0_5 = arith.constant 0 : index
    %c0_6 = arith.constant 0 : index
    %7 = vector.load %arg4[%c0_5, %c0_6] : memref<16x128xf32, #tpu.memory_space<vmem>>, vector<16x128xf32>
    tpu.vector_store %arg4[%c0_5, %c0_6], %6 {strides = array<i32>} : memref<16x128xf32, #tpu.memory_space<vmem>>, vector<16x128xf32>,
    return
  }
  func.func @transform_0(%arg0: i32) -> (i32, i32) {
    %c0_i32 = arith.constant 0 : i32
    %c0_i32_0 = arith.constant 0 : i32
    %c0_i32_1 = arith.constant 0 : i32
    return %c0_i32, %c0_i32_0 : i32, i32
  }
  func.func @transform_1(%arg0: i32) -> (i32, i32) {
    %c0_i32 = arith.constant 0 : i32
    %c0_i32_0 = arith.constant 0 : i32
    return %c0_i32, %arg0 : i32, i32
  }
  func.func @transform_2(%arg0: i32) -> (i32, i32) {
    %c0_i32 = arith.constant 0 : i32
    %c0_i32_0 = arith.constant 0 : i32
    return %c0_i32, %arg0 : i32, i32
  }
  func.func @transform_3(%arg0: i32) -> (i32, i32) {
    %c0_i32 = arith.constant 0 : i32
    %c0_i32_0 = arith.constant 0 : i32
    return %c0_i32, %arg0 : i32, i32
  }
}

module attributes {stable_mosaic.version = 11 : i64} {
  func.func @_stack_kernel(%arg0: i32, %arg1: memref<2x8x32xbf16, #tpu.memory_space<vmem>>, %arg2: memref<8x32xbf16, #tpu.memory_space<vmem>>, %arg3: memref<1x32x96xbf16, #tpu.memory_space<vmem>>, %arg4: memref<1x1x96xbf16, #tpu.memory_space<vmem>>, %arg5: memref<1x32x32xbf16, #tpu.memory_space<vmem>>, %arg6: memref<1x1x32xbf16, #tpu.memory_space<vmem>>, %arg7: memref<1x1x32xbf16, #tpu.memory_space<vmem>>, %arg8: memref<1x1x32xbf16, #tpu.memory_space<vmem>>, %arg9: memref<1x32x64xbf16, #tpu.memory_space<vmem>>, %arg10: memref<1x1x64xbf16, #tpu.memory_space<vmem>>, %arg11: memref<1x64x32xbf16, #tpu.memory_space<vmem>>, %arg12: memref<1x1x32xbf16, #tpu.memory_space<vmem>>, %arg13: memref<1x1x32xbf16, #tpu.memory_space<vmem>>, %arg14: memref<1x1x32xbf16, #tpu.memory_space<vmem>>, %arg15: memref<2x8x32xbf16, #tpu.memory_space<vmem>>, %arg16: memref<2x8x32xf32, #tpu.memory_space<vmem>>, %arg17: memref<8x32xf32, #tpu.memory_space<vmem>>) attributes {dimension_semantics = [#tpu.dimension_semantics<arbitrary>], iteration_bounds = array<i64: 2>, scalar_prefetch = 0 : i64, scratch_operands = 2 : i64, tpu.core_type = #tpu.core_type<tc>, window_params = [{pipeline_mode = #tpu.pipeline_mode<synchronous>, transform_indices = @transform_0, window_bounds = array<i64: 2, 8, 32>}, {pipeline_mode = #tpu.pipeline_mode<synchronous>, transform_indices = @transform_1, window_bounds = array<i64: 8, 32>}, {transform_indices = @transform_2, window_bounds = array<i64: 1, 32, 96>}, {transform_indices = @transform_3, window_bounds = array<i64: 1, 1, 96>}, {transform_indices = @transform_4, window_bounds = array<i64: 1, 32, 32>}, {transform_indices = @transform_5, window_bounds = array<i64: 1, 1, 32>}, {transform_indices = @transform_6, window_bounds = array<i64: 1, 1, 32>}, {transform_indices = @transform_7, window_bounds = array<i64: 1, 1, 32>}, {transform_indices = @transform_8, window_bounds = array<i64: 1, 32, 64>}, {transform_indices = @transform_9, window_bounds = array<i64: 1, 1, 64>}, {transform_indices = @transform_10, window_bounds = array<i64: 1, 64, 32>}, {transform_indices = @transform_11, window_bounds = array<i64: 1, 1, 32>}, {transform_indices = @transform_12, window_bounds = array<i64: 1, 1, 32>}, {transform_indices = @transform_13, window_bounds = array<i64: 1, 1, 32>}, {pipeline_mode = #tpu.pipeline_mode<synchronous>, transform_indices = @transform_14, window_bounds = array<i64: 2, 8, 32>}]} {
    %c0_i32 = arith.constant 0 : i32
    %0 = arith.cmpi eq, %arg0, %c0_i32 : i32
    %1 = arith.extui %0 : i1 to i32
    %c0_i32_0 = arith.constant 0 : i32
    %2 = arith.cmpi ne, %1, %c0_i32_0 : i32
    scf.if %2 {
      %c0_128 = arith.constant 0 : index
      %c0_129 = arith.constant 0 : index
      %c0_130 = arith.constant 0 : index
      %322 = vector.load %arg1[%c0_128, %c0_129, %c0_130] : memref<2x8x32xbf16, #tpu.memory_space<vmem>>, vector<2x8x32xbf16>
      %323 = arith.extf %322 : vector<2x8x32xbf16> to vector<2x8x32xf32>
      %cst_131 = arith.constant 5.65685415 : f32
      %324 = vector.broadcast %cst_131 : f32 to vector<2x8x32xf32>
      %325 = arith.mulf %323, %324 : vector<2x8x32xf32>
      %c0_132 = arith.constant 0 : index
      %c0_133 = arith.constant 0 : index
      %326 = vector.load %arg2[%c0_132, %c0_133] : memref<8x32xbf16, #tpu.memory_space<vmem>>, vector<8x32xbf16>
      %327 = arith.extf %326 : vector<8x32xbf16> to vector<8x32xf32>
      %328 = vector.shape_cast %327 : vector<8x32xf32> to vector<1x8x32xf32>
      %329 = vector.broadcast %328 : vector<1x8x32xf32> to vector<2x8x32xf32>
      %330 = arith.addf %325, %329 : vector<2x8x32xf32>
      %c0_134 = arith.constant 0 : index
      %c0_135 = arith.constant 0 : index
      %c0_136 = arith.constant 0 : index
      %331 = vector.load %arg16[%c0_134, %c0_135, %c0_136] : memref<2x8x32xf32, #tpu.memory_space<vmem>>, vector<2x8x32xf32>
      tpu.vector_store %arg16[%c0_134, %c0_135, %c0_136], %330 {strides = array<i32>} : memref<2x8x32xf32, #tpu.memory_space<vmem>>, vector<2x8x32xf32>,
    } else {
    }
    %c0 = arith.constant 0 : index
    %c0_1 = arith.constant 0 : index
    %c0_2 = arith.constant 0 : index
    %3 = vector.load %arg3[%c0, %c0_1, %c0_2] : memref<1x32x96xbf16, #tpu.memory_space<vmem>>, vector<1x32x96xbf16>
    %4 = vector.shape_cast %3 : vector<1x32x96xbf16> to vector<32x96xbf16>
    %c0_3 = arith.constant 0 : index
    %c0_4 = arith.constant 0 : index
    %c0_5 = arith.constant 0 : index
    %5 = vector.load %arg4[%c0_3, %c0_4, %c0_5] : memref<1x1x96xbf16, #tpu.memory_space<vmem>>, vector<1x1x96xbf16>
    %6 = vector.shape_cast %5 : vector<1x1x96xbf16> to vector<1x96xbf16>
    %7 = arith.extf %6 : vector<1x96xbf16> to vector<1x96xf32>
    %c0_6 = arith.constant 0 : index
    %c0_7 = arith.constant 0 : index
    %c0_8 = arith.constant 0 : index
    %8 = vector.load %arg5[%c0_6, %c0_7, %c0_8] : memref<1x32x32xbf16, #tpu.memory_space<vmem>>, vector<1x32x32xbf16>
    %9 = vector.shape_cast %8 : vector<1x32x32xbf16> to vector<32x32xbf16>
    %c0_9 = arith.constant 0 : index
    %c0_10 = arith.constant 0 : index
    %c0_11 = arith.constant 0 : index
    %10 = vector.load %arg6[%c0_9, %c0_10, %c0_11] : memref<1x1x32xbf16, #tpu.memory_space<vmem>>, vector<1x1x32xbf16>
    %11 = vector.shape_cast %10 : vector<1x1x32xbf16> to vector<1x32xbf16>
    %12 = arith.extf %11 : vector<1x32xbf16> to vector<1x32xf32>
    %c0_12 = arith.constant 0 : index
    %c0_13 = arith.constant 0 : index
    %c0_14 = arith.constant 0 : index
    %13 = vector.load %arg7[%c0_12, %c0_13, %c0_14] : memref<1x1x32xbf16, #tpu.memory_space<vmem>>, vector<1x1x32xbf16>
    %14 = vector.shape_cast %13 : vector<1x1x32xbf16> to vector<1x32xbf16>
    %15 = arith.extf %14 : vector<1x32xbf16> to vector<1x32xf32>
    %c0_15 = arith.constant 0 : index
    %c0_16 = arith.constant 0 : index
    %c0_17 = arith.constant 0 : index
    %16 = vector.load %arg8[%c0_15, %c0_16, %c0_17] : memref<1x1x32xbf16, #tpu.memory_space<vmem>>, vector<1x1x32xbf16>
    %17 = vector.shape_cast %16 : vector<1x1x32xbf16> to vector<1x32xbf16>
    %18 = arith.extf %17 : vector<1x32xbf16> to vector<1x32xf32>
    %c0_18 = arith.constant 0 : index
    %c0_19 = arith.constant 0 : index
    %c0_20 = arith.constant 0 : index
    %19 = vector.load %arg9[%c0_18, %c0_19, %c0_20] : memref<1x32x64xbf16, #tpu.memory_space<vmem>>, vector<1x32x64xbf16>
    %20 = vector.shape_cast %19 : vector<1x32x64xbf16> to vector<32x64xbf16>
    %c0_21 = arith.constant 0 : index
    %c0_22 = arith.constant 0 : index
    %c0_23 = arith.constant 0 : index
    %21 = vector.load %arg10[%c0_21, %c0_22, %c0_23] : memref<1x1x64xbf16, #tpu.memory_space<vmem>>, vector<1x1x64xbf16>
    %22 = vector.shape_cast %21 : vector<1x1x64xbf16> to vector<1x64xbf16>
    %23 = arith.extf %22 : vector<1x64xbf16> to vector<1x64xf32>
    %c0_24 = arith.constant 0 : index
    %c0_25 = arith.constant 0 : index
    %c0_26 = arith.constant 0 : index
    %24 = vector.load %arg11[%c0_24, %c0_25, %c0_26] : memref<1x64x32xbf16, #tpu.memory_space<vmem>>, vector<1x64x32xbf16>
    %25 = vector.shape_cast %24 : vector<1x64x32xbf16> to vector<64x32xbf16>
    %c0_27 = arith.constant 0 : index
    %c0_28 = arith.constant 0 : index
    %c0_29 = arith.constant 0 : index
    %26 = vector.load %arg12[%c0_27, %c0_28, %c0_29] : memref<1x1x32xbf16, #tpu.memory_space<vmem>>, vector<1x1x32xbf16>
    %27 = vector.shape_cast %26 : vector<1x1x32xbf16> to vector<1x32xbf16>
    %28 = arith.extf %27 : vector<1x32xbf16> to vector<1x32xf32>
    %c0_30 = arith.constant 0 : index
    %c0_31 = arith.constant 0 : index
    %c0_32 = arith.constant 0 : index
    %29 = vector.load %arg13[%c0_30, %c0_31, %c0_32] : memref<1x1x32xbf16, #tpu.memory_space<vmem>>, vector<1x1x32xbf16>
    %30 = vector.shape_cast %29 : vector<1x1x32xbf16> to vector<1x32xbf16>
    %31 = arith.extf %30 : vector<1x32xbf16> to vector<1x32xf32>
    %c0_33 = arith.constant 0 : index
    %c0_34 = arith.constant 0 : index
    %c0_35 = arith.constant 0 : index
    %32 = vector.load %arg14[%c0_33, %c0_34, %c0_35] : memref<1x1x32xbf16, #tpu.memory_space<vmem>>, vector<1x1x32xbf16>
    %33 = vector.shape_cast %32 : vector<1x1x32xbf16> to vector<1x32xbf16>
    %34 = arith.extf %33 : vector<1x32xbf16> to vector<1x32xf32>
    %c0_36 = arith.constant 0 : index
    %c0_37 = arith.constant 0 : index
    %c0_38 = arith.constant 0 : index
    %35 = vector.load %arg16[%c0_36, %c0_37, %c0_38] : memref<2x8x32xf32, #tpu.memory_space<vmem>>, vector<1x8x32xf32>
    %36 = vector.shape_cast %35 : vector<1x8x32xf32> to vector<8x32xf32>
    %37 = arith.truncf %36 : vector<8x32xf32> to vector<8x32xbf16>
    %cst = arith.constant dense<0.000000e+00> : vector<8x96xf32>
    %38 = tpu.matmul %37, %4, %cst {dimension_numbers = #tpu.dot_dimension_numbers<[1], [0], [0], [1], [0, 0, 1, 1], [], []>} : vector<8x32xbf16>, vector<32x96xbf16>, vector<8x96xf32> -> vector<8x96xf32>
    %39 = vector.broadcast %7 : vector<1x96xf32> to vector<8x96xf32>
    %40 = arith.addf %38, %39 : vector<8x96xf32>
    %41 = vector.extract_strided_slice %40 {offsets = [0, 0], sizes = [8, 32], strides = [1, 1]} : vector<8x96xf32> to vector<8x32xf32>
    %cst_39 = arith.constant 0.353553385 : f32
    %42 = vector.broadcast %cst_39 : f32 to vector<8x32xf32>
    %43 = arith.mulf %41, %42 : vector<8x32xf32>
    %44 = arith.truncf %43 : vector<8x32xf32> to vector<8x32xbf16>
    %45 = vector.extract_strided_slice %40 {offsets = [0, 32], sizes = [8, 32], strides = [1, 1]} : vector<8x96xf32> to vector<8x32xf32>
    %46 = arith.truncf %45 : vector<8x32xf32> to vector<8x32xbf16>
    %47 = vector.extract_strided_slice %40 {offsets = [0, 64], sizes = [8, 32], strides = [1, 1]} : vector<8x96xf32> to vector<8x32xf32>
    %48 = arith.truncf %47 : vector<8x32xf32> to vector<8x32xbf16>
    %49 = vector.extract_strided_slice %44 {offsets = [0, 0], sizes = [8, 8], strides = [1, 1]} : vector<8x32xbf16> to vector<8x8xbf16>
    %50 = vector.extract_strided_slice %46 {offsets = [0, 0], sizes = [8, 8], strides = [1, 1]} : vector<8x32xbf16> to vector<8x8xbf16>
    %51 = vector.extract_strided_slice %48 {offsets = [0, 0], sizes = [8, 8], strides = [1, 1]} : vector<8x32xbf16> to vector<8x8xbf16>
    %cst_40 = arith.constant dense<0.000000e+00> : vector<8x8xf32>
    %52 = tpu.matmul %49, %50, %cst_40 {dimension_numbers = #tpu.dot_dimension_numbers<[1], [1], [0], [0], [0, 0, 1, 0], [], []>} : vector<8x8xbf16>, vector<8x8xbf16>, vector<8x8xf32> -> vector<8x8xf32>
    %cst_41 = arith.constant dense<0xFF800000> : vector<8xf32>
    %53 = vector.multi_reduction <maximumf>, %52, %cst_41 [1] : vector<8x8xf32> to vector<8xf32>
    %54 = vector.shape_cast %53 : vector<8xf32> to vector<8x1xf32>
    %55 = vector.broadcast %54 : vector<8x1xf32> to vector<8x8xf32>
    %56 = arith.subf %52, %55 : vector<8x8xf32>
    %57 = math.exp %56 : vector<8x8xf32>
    %cst_42 = arith.constant dense<0.000000e+00> : vector<8xf32>
    %58 = vector.multi_reduction <add>, %57, %cst_42 [1] : vector<8x8xf32> to vector<8xf32>
    %59 = vector.shape_cast %58 : vector<8xf32> to vector<8x1xf32>
    %60 = vector.broadcast %59 : vector<8x1xf32> to vector<8x8xf32>
    %61 = arith.divf %57, %60 : vector<8x8xf32>
    %62 = arith.truncf %61 : vector<8x8xf32> to vector<8x8xbf16>
    %cst_43 = arith.constant dense<0.000000e+00> : vector<8x8xf32>
    %63 = tpu.matmul %62, %51, %cst_43 {dimension_numbers = #tpu.dot_dimension_numbers<[1], [0], [0], [1], [0, 0, 1, 1], [], []>} : vector<8x8xbf16>, vector<8x8xbf16>, vector<8x8xf32> -> vector<8x8xf32>
    %c0_44 = arith.constant 0 : index
    %c0_45 = arith.constant 0 : index
    %64 = vector.load %arg17[%c0_44, %c0_45] : memref<8x32xf32, #tpu.memory_space<vmem>>, vector<8x8xf32>
    tpu.vector_store %arg17[%c0_44, %c0_45], %63 {strides = array<i32>} : memref<8x32xf32, #tpu.memory_space<vmem>>, vector<8x8xf32>,
    %65 = vector.extract_strided_slice %44 {offsets = [0, 8], sizes = [8, 8], strides = [1, 1]} : vector<8x32xbf16> to vector<8x8xbf16>
    %66 = vector.extract_strided_slice %46 {offsets = [0, 8], sizes = [8, 8], strides = [1, 1]} : vector<8x32xbf16> to vector<8x8xbf16>
    %67 = vector.extract_strided_slice %48 {offsets = [0, 8], sizes = [8, 8], strides = [1, 1]} : vector<8x32xbf16> to vector<8x8xbf16>
    %cst_46 = arith.constant dense<0.000000e+00> : vector<8x8xf32>
    %68 = tpu.matmul %65, %66, %cst_46 {dimension_numbers = #tpu.dot_dimension_numbers<[1], [1], [0], [0], [0, 0, 1, 0], [], []>} : vector<8x8xbf16>, vector<8x8xbf16>, vector<8x8xf32> -> vector<8x8xf32>
    %cst_47 = arith.constant dense<0xFF800000> : vector<8xf32>
    %69 = vector.multi_reduction <maximumf>, %68, %cst_47 [1] : vector<8x8xf32> to vector<8xf32>
    %70 = vector.shape_cast %69 : vector<8xf32> to vector<8x1xf32>
    %71 = vector.broadcast %70 : vector<8x1xf32> to vector<8x8xf32>
    %72 = arith.subf %68, %71 : vector<8x8xf32>
    %73 = math.exp %72 : vector<8x8xf32>
    %cst_48 = arith.constant dense<0.000000e+00> : vector<8xf32>
    %74 = vector.multi_reduction <add>, %73, %cst_48 [1] : vector<8x8xf32> to vector<8xf32>
    %75 = vector.shape_cast %74 : vector<8xf32> to vector<8x1xf32>
    %76 = vector.broadcast %75 : vector<8x1xf32> to vector<8x8xf32>
    %77 = arith.divf %73, %76 : vector<8x8xf32>
    %78 = arith.truncf %77 : vector<8x8xf32> to vector<8x8xbf16>
    %cst_49 = arith.constant dense<0.000000e+00> : vector<8x8xf32>
    %79 = tpu.matmul %78, %67, %cst_49 {dimension_numbers = #tpu.dot_dimension_numbers<[1], [0], [0], [1], [0, 0, 1, 1], [], []>} : vector<8x8xbf16>, vector<8x8xbf16>, vector<8x8xf32> -> vector<8x8xf32>
    %c0_50 = arith.constant 0 : index
    %c8 = arith.constant 8 : index
    %80 = vector.load %arg17[%c0_50, %c8] : memref<8x32xf32, #tpu.memory_space<vmem>>, vector<8x8xf32>
    tpu.vector_store %arg17[%c0_50, %c8], %79 {strides = array<i32>} : memref<8x32xf32, #tpu.memory_space<vmem>>, vector<8x8xf32>,
    %81 = vector.extract_strided_slice %44 {offsets = [0, 16], sizes = [8, 8], strides = [1, 1]} : vector<8x32xbf16> to vector<8x8xbf16>
    %82 = vector.extract_strided_slice %46 {offsets = [0, 16], sizes = [8, 8], strides = [1, 1]} : vector<8x32xbf16> to vector<8x8xbf16>
    %83 = vector.extract_strided_slice %48 {offsets = [0, 16], sizes = [8, 8], strides = [1, 1]} : vector<8x32xbf16> to vector<8x8xbf16>
    %cst_51 = arith.constant dense<0.000000e+00> : vector<8x8xf32>
    %84 = tpu.matmul %81, %82, %cst_51 {dimension_numbers = #tpu.dot_dimension_numbers<[1], [1], [0], [0], [0, 0, 1, 0], [], []>} : vector<8x8xbf16>, vector<8x8xbf16>, vector<8x8xf32> -> vector<8x8xf32>
    %cst_52 = arith.constant dense<0xFF800000> : vector<8xf32>
    %85 = vector.multi_reduction <maximumf>, %84, %cst_52 [1] : vector<8x8xf32> to vector<8xf32>
    %86 = vector.shape_cast %85 : vector<8xf32> to vector<8x1xf32>
    %87 = vector.broadcast %86 : vector<8x1xf32> to vector<8x8xf32>
    %88 = arith.subf %84, %87 : vector<8x8xf32>
    %89 = math.exp %88 : vector<8x8xf32>
    %cst_53 = arith.constant dense<0.000000e+00> : vector<8xf32>
    %90 = vector.multi_reduction <add>, %89, %cst_53 [1] : vector<8x8xf32> to vector<8xf32>
    %91 = vector.shape_cast %90 : vector<8xf32> to vector<8x1xf32>
    %92 = vector.broadcast %91 : vector<8x1xf32> to vector<8x8xf32>
    %93 = arith.divf %89, %92 : vector<8x8xf32>
    %94 = arith.truncf %93 : vector<8x8xf32> to vector<8x8xbf16>
    %cst_54 = arith.constant dense<0.000000e+00> : vector<8x8xf32>
    %95 = tpu.matmul %94, %83, %cst_54 {dimension_numbers = #tpu.dot_dimension_numbers<[1], [0], [0], [1], [0, 0, 1, 1], [], []>} : vector<8x8xbf16>, vector<8x8xbf16>, vector<8x8xf32> -> vector<8x8xf32>
    %c0_55 = arith.constant 0 : index
    %c16 = arith.constant 16 : index
    %96 = vector.load %arg17[%c0_55, %c16] : memref<8x32xf32, #tpu.memory_space<vmem>>, vector<8x8xf32>
    tpu.vector_store %arg17[%c0_55, %c16], %95 {strides = array<i32>} : memref<8x32xf32, #tpu.memory_space<vmem>>, vector<8x8xf32>,
    %97 = vector.extract_strided_slice %44 {offsets = [0, 24], sizes = [8, 8], strides = [1, 1]} : vector<8x32xbf16> to vector<8x8xbf16>
    %98 = vector.extract_strided_slice %46 {offsets = [0, 24], sizes = [8, 8], strides = [1, 1]} : vector<8x32xbf16> to vector<8x8xbf16>
    %99 = vector.extract_strided_slice %48 {offsets = [0, 24], sizes = [8, 8], strides = [1, 1]} : vector<8x32xbf16> to vector<8x8xbf16>
    %cst_56 = arith.constant dense<0.000000e+00> : vector<8x8xf32>
    %100 = tpu.matmul %97, %98, %cst_56 {dimension_numbers = #tpu.dot_dimension_numbers<[1], [1], [0], [0], [0, 0, 1, 0], [], []>} : vector<8x8xbf16>, vector<8x8xbf16>, vector<8x8xf32> -> vector<8x8xf32>
    %cst_57 = arith.constant dense<0xFF800000> : vector<8xf32>
    %101 = vector.multi_reduction <maximumf>, %100, %cst_57 [1] : vector<8x8xf32> to vector<8xf32>
    %102 = vector.shape_cast %101 : vector<8xf32> to vector<8x1xf32>
    %103 = vector.broadcast %102 : vector<8x1xf32> to vector<8x8xf32>
    %104 = arith.subf %100, %103 : vector<8x8xf32>
    %105 = math.exp %104 : vector<8x8xf32>
    %cst_58 = arith.constant dense<0.000000e+00> : vector<8xf32>
    %106 = vector.multi_reduction <add>, %105, %cst_58 [1] : vector<8x8xf32> to vector<8xf32>
    %107 = vector.shape_cast %106 : vector<8xf32> to vector<8x1xf32>
    %108 = vector.broadcast %107 : vector<8x1xf32> to vector<8x8xf32>
    %109 = arith.divf %105, %108 : vector<8x8xf32>
    %110 = arith.truncf %109 : vector<8x8xf32> to vector<8x8xbf16>
    %cst_59 = arith.constant dense<0.000000e+00> : vector<8x8xf32>
    %111 = tpu.matmul %110, %99, %cst_59 {dimension_numbers = #tpu.dot_dimension_numbers<[1], [0], [0], [1], [0, 0, 1, 1], [], []>} : vector<8x8xbf16>, vector<8x8xbf16>, vector<8x8xf32> -> vector<8x8xf32>
    %c0_60 = arith.constant 0 : index
    %c24 = arith.constant 24 : index
    %112 = vector.load %arg17[%c0_60, %c24] : memref<8x32xf32, #tpu.memory_space<vmem>>, vector<8x8xf32>
    tpu.vector_store %arg17[%c0_60, %c24], %111 {strides = array<i32>} : memref<8x32xf32, #tpu.memory_space<vmem>>, vector<8x8xf32>,
    %c0_61 = arith.constant 0 : index
    %c0_62 = arith.constant 0 : index
    %113 = vector.load %arg17[%c0_61, %c0_62] : memref<8x32xf32, #tpu.memory_space<vmem>>, vector<8x32xf32>
    %114 = arith.truncf %113 : vector<8x32xf32> to vector<8x32xbf16>
    %cst_63 = arith.constant dense<0.000000e+00> : vector<8x32xf32>
    %115 = tpu.matmul %114, %9, %cst_63 {dimension_numbers = #tpu.dot_dimension_numbers<[1], [0], [0], [1], [0, 0, 1, 1], [], []>} : vector<8x32xbf16>, vector<32x32xbf16>, vector<8x32xf32> -> vector<8x32xf32>
    %116 = vector.broadcast %12 : vector<1x32xf32> to vector<8x32xf32>
    %117 = arith.addf %115, %116 : vector<8x32xf32>
    %118 = arith.addf %36, %117 : vector<8x32xf32>
    %cst_64 = arith.constant dense<0.000000e+00> : vector<8xf32>
    %119 = vector.multi_reduction <add>, %118, %cst_64 [1] : vector<8x32xf32> to vector<8xf32>
    %120 = vector.shape_cast %119 : vector<8xf32> to vector<8x1xf32>
    %cst_65 = arith.constant 3.200000e+01 : f32
    %121 = vector.broadcast %cst_65 : f32 to vector<8x1xf32>
    %122 = arith.divf %120, %121 : vector<8x1xf32>
    %123 = vector.broadcast %122 : vector<8x1xf32> to vector<8x32xf32>
    %124 = arith.subf %118, %123 : vector<8x32xf32>
    %125 = arith.mulf %124, %124 : vector<8x32xf32>
    %cst_66 = arith.constant dense<0.000000e+00> : vector<8xf32>
    %126 = vector.multi_reduction <add>, %125, %cst_66 [1] : vector<8x32xf32> to vector<8xf32>
    %127 = vector.shape_cast %126 : vector<8xf32> to vector<8x1xf32>
    %cst_67 = arith.constant 3.200000e+01 : f32
    %128 = vector.broadcast %cst_67 : f32 to vector<8x1xf32>
    %129 = arith.divf %127, %128 : vector<8x1xf32>
    %130 = vector.broadcast %122 : vector<8x1xf32> to vector<8x32xf32>
    %131 = arith.subf %118, %130 : vector<8x32xf32>
    %cst_68 = arith.constant 9.99999974E-6 : f32
    %132 = vector.broadcast %cst_68 : f32 to vector<8x1xf32>
    %133 = arith.addf %129, %132 : vector<8x1xf32>
    %134 = math.rsqrt %133 : vector<8x1xf32>
    %135 = vector.broadcast %134 : vector<8x1xf32> to vector<8x32xf32>
    %136 = arith.mulf %131, %135 : vector<8x32xf32>
    %137 = vector.broadcast %15 : vector<1x32xf32> to vector<8x32xf32>
    %138 = arith.mulf %136, %137 : vector<8x32xf32>
    %139 = vector.broadcast %18 : vector<1x32xf32> to vector<8x32xf32>
    %140 = arith.addf %138, %139 : vector<8x32xf32>
    %141 = arith.truncf %140 : vector<8x32xf32> to vector<8x32xbf16>
    %cst_69 = arith.constant dense<0.000000e+00> : vector<8x64xf32>
    %142 = tpu.matmul %141, %20, %cst_69 {dimension_numbers = #tpu.dot_dimension_numbers<[1], [0], [0], [1], [0, 0, 1, 1], [], []>} : vector<8x32xbf16>, vector<32x64xbf16>, vector<8x64xf32> -> vector<8x64xf32>
    %143 = vector.broadcast %23 : vector<1x64xf32> to vector<8x64xf32>
    %144 = arith.addf %142, %143 : vector<8x64xf32>
    %cst_70 = arith.constant 0.000000e+00 : f32
    %145 = vector.broadcast %cst_70 : f32 to vector<8x64xf32>
    %146 = arith.maximumf %144, %145 : vector<8x64xf32>
    %147 = arith.truncf %146 : vector<8x64xf32> to vector<8x64xbf16>
    %cst_71 = arith.constant dense<0.000000e+00> : vector<8x32xf32>
    %148 = tpu.matmul %147, %25, %cst_71 {dimension_numbers = #tpu.dot_dimension_numbers<[1], [0], [0], [1], [0, 0, 1, 1], [], []>} : vector<8x64xbf16>, vector<64x32xbf16>, vector<8x32xf32> -> vector<8x32xf32>
    %149 = vector.broadcast %28 : vector<1x32xf32> to vector<8x32xf32>
    %150 = arith.addf %148, %149 : vector<8x32xf32>
    %151 = arith.addf %140, %150 : vector<8x32xf32>
    %cst_72 = arith.constant dense<0.000000e+00> : vector<8xf32>
    %152 = vector.multi_reduction <add>, %151, %cst_72 [1] : vector<8x32xf32> to vector<8xf32>
    %153 = vector.shape_cast %152 : vector<8xf32> to vector<8x1xf32>
    %cst_73 = arith.constant 3.200000e+01 : f32
    %154 = vector.broadcast %cst_73 : f32 to vector<8x1xf32>
    %155 = arith.divf %153, %154 : vector<8x1xf32>
    %156 = vector.broadcast %155 : vector<8x1xf32> to vector<8x32xf32>
    %157 = arith.subf %151, %156 : vector<8x32xf32>
    %158 = arith.mulf %157, %157 : vector<8x32xf32>
    %cst_74 = arith.constant dense<0.000000e+00> : vector<8xf32>
    %159 = vector.multi_reduction <add>, %158, %cst_74 [1] : vector<8x32xf32> to vector<8xf32>
    %160 = vector.shape_cast %159 : vector<8xf32> to vector<8x1xf32>
    %cst_75 = arith.constant 3.200000e+01 : f32
    %161 = vector.broadcast %cst_75 : f32 to vector<8x1xf32>
    %162 = arith.divf %160, %161 : vector<8x1xf32>
    %163 = vector.broadcast %155 : vector<8x1xf32> to vector<8x32xf32>
    %164 = arith.subf %151, %163 : vector<8x32xf32>
    %cst_76 = arith.constant 9.99999974E-6 : f32
    %165 = vector.broadcast %cst_76 : f32 to vector<8x1xf32>
    %166 = arith.addf %162, %165 : vector<8x1xf32>
    %167 = math.rsqrt %166 : vector<8x1xf32>
    %168 = vector.broadcast %167 : vector<8x1xf32> to vector<8x32xf32>
    %169 = arith.mulf %164, %168 : vector<8x32xf32>
    %170 = vector.broadcast %31 : vector<1x32xf32> to vector<8x32xf32>
    %171 = arith.mulf %169, %170 : vector<8x32xf32>
    %172 = vector.broadcast %34 : vector<1x32xf32> to vector<8x32xf32>
    %173 = arith.addf %171, %172 : vector<8x32xf32>
    %c0_77 = arith.constant 0 : index
    %c0_78 = arith.constant 0 : index
    %c0_79 = arith.constant 0 : index
    %174 = vector.load %arg16[%c0_77, %c0_78, %c0_79] : memref<2x8x32xf32, #tpu.memory_space<vmem>>, vector<1x8x32xf32>
    %175 = vector.shape_cast %174 : vector<1x8x32xf32> to vector<8x32xf32>
    %176 = vector.shape_cast %173 : vector<8x32xf32> to vector<1x8x32xf32>
    tpu.vector_store %arg16[%c0_77, %c0_78, %c0_79], %176 {strides = array<i32>} : memref<2x8x32xf32, #tpu.memory_space<vmem>>, vector<1x8x32xf32>,
    %c1 = arith.constant 1 : index
    %c0_80 = arith.constant 0 : index
    %c0_81 = arith.constant 0 : index
    %177 = vector.load %arg16[%c1, %c0_80, %c0_81] : memref<2x8x32xf32, #tpu.memory_space<vmem>>, vector<1x8x32xf32>
    %178 = vector.shape_cast %177 : vector<1x8x32xf32> to vector<8x32xf32>
    %179 = arith.truncf %178 : vector<8x32xf32> to vector<8x32xbf16>
    %cst_82 = arith.constant dense<0.000000e+00> : vector<8x96xf32>
    %180 = tpu.matmul %179, %4, %cst_82 {dimension_numbers = #tpu.dot_dimension_numbers<[1], [0], [0], [1], [0, 0, 1, 1], [], []>} : vector<8x32xbf16>, vector<32x96xbf16>, vector<8x96xf32> -> vector<8x96xf32>
    %181 = vector.broadcast %7 : vector<1x96xf32> to vector<8x96xf32>
    %182 = arith.addf %180, %181 : vector<8x96xf32>
    %183 = vector.extract_strided_slice %182 {offsets = [0, 0], sizes = [8, 32], strides = [1, 1]} : vector<8x96xf32> to vector<8x32xf32>
    %cst_83 = arith.constant 0.353553385 : f32
    %184 = vector.broadcast %cst_83 : f32 to vector<8x32xf32>
    %185 = arith.mulf %183, %184 : vector<8x32xf32>
    %186 = arith.truncf %185 : vector<8x32xf32> to vector<8x32xbf16>
    %187 = vector.extract_strided_slice %182 {offsets = [0, 32], sizes = [8, 32], strides = [1, 1]} : vector<8x96xf32> to vector<8x32xf32>
    %188 = arith.truncf %187 : vector<8x32xf32> to vector<8x32xbf16>
    %189 = vector.extract_strided_slice %182 {offsets = [0, 64], sizes = [8, 32], strides = [1, 1]} : vector<8x96xf32> to vector<8x32xf32>
    %190 = arith.truncf %189 : vector<8x32xf32> to vector<8x32xbf16>
    %191 = vector.extract_strided_slice %186 {offsets = [0, 0], sizes = [8, 8], strides = [1, 1]} : vector<8x32xbf16> to vector<8x8xbf16>
    %192 = vector.extract_strided_slice %188 {offsets = [0, 0], sizes = [8, 8], strides = [1, 1]} : vector<8x32xbf16> to vector<8x8xbf16>
    %193 = vector.extract_strided_slice %190 {offsets = [0, 0], sizes = [8, 8], strides = [1, 1]} : vector<8x32xbf16> to vector<8x8xbf16>
    %cst_84 = arith.constant dense<0.000000e+00> : vector<8x8xf32>
    %194 = tpu.matmul %191, %192, %cst_84 {dimension_numbers = #tpu.dot_dimension_numbers<[1], [1], [0], [0], [0, 0, 1, 0], [], []>} : vector<8x8xbf16>, vector<8x8xbf16>, vector<8x8xf32> -> vector<8x8xf32>
    %cst_85 = arith.constant dense<0xFF800000> : vector<8xf32>
    %195 = vector.multi_reduction <maximumf>, %194, %cst_85 [1] : vector<8x8xf32> to vector<8xf32>
    %196 = vector.shape_cast %195 : vector<8xf32> to vector<8x1xf32>
    %197 = vector.broadcast %196 : vector<8x1xf32> to vector<8x8xf32>
    %198 = arith.subf %194, %197 : vector<8x8xf32>
    %199 = math.exp %198 : vector<8x8xf32>
    %cst_86 = arith.constant dense<0.000000e+00> : vector<8xf32>
    %200 = vector.multi_reduction <add>, %199, %cst_86 [1] : vector<8x8xf32> to vector<8xf32>
    %201 = vector.shape_cast %200 : vector<8xf32> to vector<8x1xf32>
    %202 = vector.broadcast %201 : vector<8x1xf32> to vector<8x8xf32>
    %203 = arith.divf %199, %202 : vector<8x8xf32>
    %204 = arith.truncf %203 : vector<8x8xf32> to vector<8x8xbf16>
    %cst_87 = arith.constant dense<0.000000e+00> : vector<8x8xf32>
    %205 = tpu.matmul %204, %193, %cst_87 {dimension_numbers = #tpu.dot_dimension_numbers<[1], [0], [0], [1], [0, 0, 1, 1], [], []>} : vector<8x8xbf16>, vector<8x8xbf16>, vector<8x8xf32> -> vector<8x8xf32>
    %c0_88 = arith.constant 0 : index
    %c0_89 = arith.constant 0 : index
    %206 = vector.load %arg17[%c0_88, %c0_89] : memref<8x32xf32, #tpu.memory_space<vmem>>, vector<8x8xf32>
    tpu.vector_store %arg17[%c0_88, %c0_89], %205 {strides = array<i32>} : memref<8x32xf32, #tpu.memory_space<vmem>>, vector<8x8xf32>,
    %207 = vector.extract_strided_slice %186 {offsets = [0, 8], sizes = [8, 8], strides = [1, 1]} : vector<8x32xbf16> to vector<8x8xbf16>
    %208 = vector.extract_strided_slice %188 {offsets = [0, 8], sizes = [8, 8], strides = [1, 1]} : vector<8x32xbf16> to vector<8x8xbf16>
    %209 = vector.extract_strided_slice %190 {offsets = [0, 8], sizes = [8, 8], strides = [1, 1]} : vector<8x32xbf16> to vector<8x8xbf16>
    %cst_90 = arith.constant dense<0.000000e+00> : vector<8x8xf32>
    %210 = tpu.matmul %207, %208, %cst_90 {dimension_numbers = #tpu.dot_dimension_numbers<[1], [1], [0], [0], [0, 0, 1, 0], [], []>} : vector<8x8xbf16>, vector<8x8xbf16>, vector<8x8xf32> -> vector<8x8xf32>
    %cst_91 = arith.constant dense<0xFF800000> : vector<8xf32>
    %211 = vector.multi_reduction <maximumf>, %210, %cst_91 [1] : vector<8x8xf32> to vector<8xf32>
    %212 = vector.shape_cast %211 : vector<8xf32> to vector<8x1xf32>
    %213 = vector.broadcast %212 : vector<8x1xf32> to vector<8x8xf32>
    %214 = arith.subf %210, %213 : vector<8x8xf32>
    %215 = math.exp %214 : vector<8x8xf32>
    %cst_92 = arith.constant dense<0.000000e+00> : vector<8xf32>
    %216 = vector.multi_reduction <add>, %215, %cst_92 [1] : vector<8x8xf32> to vector<8xf32>
    %217 = vector.shape_cast %216 : vector<8xf32> to vector<8x1xf32>
    %218 = vector.broadcast %217 : vector<8x1xf32> to vector<8x8xf32>
    %219 = arith.divf %215, %218 : vector<8x8xf32>
    %220 = arith.truncf %219 : vector<8x8xf32> to vector<8x8xbf16>
    %cst_93 = arith.constant dense<0.000000e+00> : vector<8x8xf32>
    %221 = tpu.matmul %220, %209, %cst_93 {dimension_numbers = #tpu.dot_dimension_numbers<[1], [0], [0], [1], [0, 0, 1, 1], [], []>} : vector<8x8xbf16>, vector<8x8xbf16>, vector<8x8xf32> -> vector<8x8xf32>
    %c0_94 = arith.constant 0 : index
    %c8_95 = arith.constant 8 : index
    %222 = vector.load %arg17[%c0_94, %c8_95] : memref<8x32xf32, #tpu.memory_space<vmem>>, vector<8x8xf32>
    tpu.vector_store %arg17[%c0_94, %c8_95], %221 {strides = array<i32>} : memref<8x32xf32, #tpu.memory_space<vmem>>, vector<8x8xf32>,
    %223 = vector.extract_strided_slice %186 {offsets = [0, 16], sizes = [8, 8], strides = [1, 1]} : vector<8x32xbf16> to vector<8x8xbf16>
    %224 = vector.extract_strided_slice %188 {offsets = [0, 16], sizes = [8, 8], strides = [1, 1]} : vector<8x32xbf16> to vector<8x8xbf16>
    %225 = vector.extract_strided_slice %190 {offsets = [0, 16], sizes = [8, 8], strides = [1, 1]} : vector<8x32xbf16> to vector<8x8xbf16>
    %cst_96 = arith.constant dense<0.000000e+00> : vector<8x8xf32>
    %226 = tpu.matmul %223, %224, %cst_96 {dimension_numbers = #tpu.dot_dimension_numbers<[1], [1], [0], [0], [0, 0, 1, 0], [], []>} : vector<8x8xbf16>, vector<8x8xbf16>, vector<8x8xf32> -> vector<8x8xf32>
    %cst_97 = arith.constant dense<0xFF800000> : vector<8xf32>
    %227 = vector.multi_reduction <maximumf>, %226, %cst_97 [1] : vector<8x8xf32> to vector<8xf32>
    %228 = vector.shape_cast %227 : vector<8xf32> to vector<8x1xf32>
    %229 = vector.broadcast %228 : vector<8x1xf32> to vector<8x8xf32>
    %230 = arith.subf %226, %229 : vector<8x8xf32>
    %231 = math.exp %230 : vector<8x8xf32>
    %cst_98 = arith.constant dense<0.000000e+00> : vector<8xf32>
    %232 = vector.multi_reduction <add>, %231, %cst_98 [1] : vector<8x8xf32> to vector<8xf32>
    %233 = vector.shape_cast %232 : vector<8xf32> to vector<8x1xf32>
    %234 = vector.broadcast %233 : vector<8x1xf32> to vector<8x8xf32>
    %235 = arith.divf %231, %234 : vector<8x8xf32>
    %236 = arith.truncf %235 : vector<8x8xf32> to vector<8x8xbf16>
    %cst_99 = arith.constant dense<0.000000e+00> : vector<8x8xf32>
    %237 = tpu.matmul %236, %225, %cst_99 {dimension_numbers = #tpu.dot_dimension_numbers<[1], [0], [0], [1], [0, 0, 1, 1], [], []>} : vector<8x8xbf16>, vector<8x8xbf16>, vector<8x8xf32> -> vector<8x8xf32>
    %c0_100 = arith.constant 0 : index
    %c16_101 = arith.constant 16 : index
    %238 = vector.load %arg17[%c0_100, %c16_101] : memref<8x32xf32, #tpu.memory_space<vmem>>, vector<8x8xf32>
    tpu.vector_store %arg17[%c0_100, %c16_101], %237 {strides = array<i32>} : memref<8x32xf32, #tpu.memory_space<vmem>>, vector<8x8xf32>,
    %239 = vector.extract_strided_slice %186 {offsets = [0, 24], sizes = [8, 8], strides = [1, 1]} : vector<8x32xbf16> to vector<8x8xbf16>
    %240 = vector.extract_strided_slice %188 {offsets = [0, 24], sizes = [8, 8], strides = [1, 1]} : vector<8x32xbf16> to vector<8x8xbf16>
    %241 = vector.extract_strided_slice %190 {offsets = [0, 24], sizes = [8, 8], strides = [1, 1]} : vector<8x32xbf16> to vector<8x8xbf16>
    %cst_102 = arith.constant dense<0.000000e+00> : vector<8x8xf32>
    %242 = tpu.matmul %239, %240, %cst_102 {dimension_numbers = #tpu.dot_dimension_numbers<[1], [1], [0], [0], [0, 0, 1, 0], [], []>} : vector<8x8xbf16>, vector<8x8xbf16>, vector<8x8xf32> -> vector<8x8xf32>
    %cst_103 = arith.constant dense<0xFF800000> : vector<8xf32>
    %243 = vector.multi_reduction <maximumf>, %242, %cst_103 [1] : vector<8x8xf32> to vector<8xf32>
    %244 = vector.shape_cast %243 : vector<8xf32> to vector<8x1xf32>
    %245 = vector.broadcast %244 : vector<8x1xf32> to vector<8x8xf32>
    %246 = arith.subf %242, %245 : vector<8x8xf32>
    %247 = math.exp %246 : vector<8x8xf32>
    %cst_104 = arith.constant dense<0.000000e+00> : vector<8xf32>
    %248 = vector.multi_reduction <add>, %247, %cst_104 [1] : vector<8x8xf32> to vector<8xf32>
    %249 = vector.shape_cast %248 : vector<8xf32> to vector<8x1xf32>
    %250 = vector.broadcast %249 : vector<8x1xf32> to vector<8x8xf32>
    %251 = arith.divf %247, %250 : vector<8x8xf32>
    %252 = arith.truncf %251 : vector<8x8xf32> to vector<8x8xbf16>
    %cst_105 = arith.constant dense<0.000000e+00> : vector<8x8xf32>
    %253 = tpu.matmul %252, %241, %cst_105 {dimension_numbers = #tpu.dot_dimension_numbers<[1], [0], [0], [1], [0, 0, 1, 1], [], []>} : vector<8x8xbf16>, vector<8x8xbf16>, vector<8x8xf32> -> vector<8x8xf32>
    %c0_106 = arith.constant 0 : index
    %c24_107 = arith.constant 24 : index
    %254 = vector.load %arg17[%c0_106, %c24_107] : memref<8x32xf32, #tpu.memory_space<vmem>>, vector<8x8xf32>
    tpu.vector_store %arg17[%c0_106, %c24_107], %253 {strides = array<i32>} : memref<8x32xf32, #tpu.memory_space<vmem>>, vector<8x8xf32>,
    %c0_108 = arith.constant 0 : index
    %c0_109 = arith.constant 0 : index
    %255 = vector.load %arg17[%c0_108, %c0_109] : memref<8x32xf32, #tpu.memory_space<vmem>>, vector<8x32xf32>
    %256 = arith.truncf %255 : vector<8x32xf32> to vector<8x32xbf16>
    %cst_110 = arith.constant dense<0.000000e+00> : vector<8x32xf32>
    %257 = tpu.matmul %256, %9, %cst_110 {dimension_numbers = #tpu.dot_dimension_numbers<[1], [0], [0], [1], [0, 0, 1, 1], [], []>} : vector<8x32xbf16>, vector<32x32xbf16>, vector<8x32xf32> -> vector<8x32xf32>
    %258 = vector.broadcast %12 : vector<1x32xf32> to vector<8x32xf32>
    %259 = arith.addf %257, %258 : vector<8x32xf32>
    %260 = arith.addf %178, %259 : vector<8x32xf32>
    %cst_111 = arith.constant dense<0.000000e+00> : vector<8xf32>
    %261 = vector.multi_reduction <add>, %260, %cst_111 [1] : vector<8x32xf32> to vector<8xf32>
    %262 = vector.shape_cast %261 : vector<8xf32> to vector<8x1xf32>
    %cst_112 = arith.constant 3.200000e+01 : f32
    %263 = vector.broadcast %cst_112 : f32 to vector<8x1xf32>
    %264 = arith.divf %262, %263 : vector<8x1xf32>
    %265 = vector.broadcast %264 : vector<8x1xf32> to vector<8x32xf32>
    %266 = arith.subf %260, %265 : vector<8x32xf32>
    %267 = arith.mulf %266, %266 : vector<8x32xf32>
    %cst_113 = arith.constant dense<0.000000e+00> : vector<8xf32>
    %268 = vector.multi_reduction <add>, %267, %cst_113 [1] : vector<8x32xf32> to vector<8xf32>
    %269 = vector.shape_cast %268 : vector<8xf32> to vector<8x1xf32>
    %cst_114 = arith.constant 3.200000e+01 : f32
    %270 = vector.broadcast %cst_114 : f32 to vector<8x1xf32>
    %271 = arith.divf %269, %270 : vector<8x1xf32>
    %272 = vector.broadcast %264 : vector<8x1xf32> to vector<8x32xf32>
    %273 = arith.subf %260, %272 : vector<8x32xf32>
    %cst_115 = arith.constant 9.99999974E-6 : f32
    %274 = vector.broadcast %cst_115 : f32 to vector<8x1xf32>
    %275 = arith.addf %271, %274 : vector<8x1xf32>
    %276 = math.rsqrt %275 : vector<8x1xf32>
    %277 = vector.broadcast %276 : vector<8x1xf32> to vector<8x32xf32>
    %278 = arith.mulf %273, %277 : vector<8x32xf32>
    %279 = vector.broadcast %15 : vector<1x32xf32> to vector<8x32xf32>
    %280 = arith.mulf %278, %279 : vector<8x32xf32>
    %281 = vector.broadcast %18 : vector<1x32xf32> to vector<8x32xf32>
    %282 = arith.addf %280, %281 : vector<8x32xf32>
    %283 = arith.truncf %282 : vector<8x32xf32> to vector<8x32xbf16>
    %cst_116 = arith.constant dense<0.000000e+00> : vector<8x64xf32>
    %284 = tpu.matmul %283, %20, %cst_116 {dimension_numbers = #tpu.dot_dimension_numbers<[1], [0], [0], [1], [0, 0, 1, 1], [], []>} : vector<8x32xbf16>, vector<32x64xbf16>, vector<8x64xf32> -> vector<8x64xf32>
    %285 = vector.broadcast %23 : vector<1x64xf32> to vector<8x64xf32>
    %286 = arith.addf %284, %285 : vector<8x64xf32>
    %cst_117 = arith.constant 0.000000e+00 : f32
    %287 = vector.broadcast %cst_117 : f32 to vector<8x64xf32>
    %288 = arith.maximumf %286, %287 : vector<8x64xf32>
    %289 = arith.truncf %288 : vector<8x64xf32> to vector<8x64xbf16>
    %cst_118 = arith.constant dense<0.000000e+00> : vector<8x32xf32>
    %290 = tpu.matmul %289, %25, %cst_118 {dimension_numbers = #tpu.dot_dimension_numbers<[1], [0], [0], [1], [0, 0, 1, 1], [], []>} : vector<8x64xbf16>, vector<64x32xbf16>, vector<8x32xf32> -> vector<8x32xf32>
    %291 = vector.broadcast %28 : vector<1x32xf32> to vector<8x32xf32>
    %292 = arith.addf %290, %291 : vector<8x32xf32>
    %293 = arith.addf %282, %292 : vector<8x32xf32>
    %cst_119 = arith.constant dense<0.000000e+00> : vector<8xf32>
    %294 = vector.multi_reduction <add>, %293, %cst_119 [1] : vector<8x32xf32> to vector<8xf32>
    %295 = vector.shape_cast %294 : vector<8xf32> to vector<8x1xf32>
    %cst_120 = arith.constant 3.200000e+01 : f32
    %296 = vector.broadcast %cst_120 : f32 to vector<8x1xf32>
    %297 = arith.divf %295, %296 : vector<8x1xf32>
    %298 = vector.broadcast %297 : vector<8x1xf32> to vector<8x32xf32>
    %299 = arith.subf %293, %298 : vector<8x32xf32>
    %300 = arith.mulf %299, %299 : vector<8x32xf32>
    %cst_121 = arith.constant dense<0.000000e+00> : vector<8xf32>
    %301 = vector.multi_reduction <add>, %300, %cst_121 [1] : vector<8x32xf32> to vector<8xf32>
    %302 = vector.shape_cast %301 : vector<8xf32> to vector<8x1xf32>
    %cst_122 = arith.constant 3.200000e+01 : f32
    %303 = vector.broadcast %cst_122 : f32 to vector<8x1xf32>
    %304 = arith.divf %302, %303 : vector<8x1xf32>
    %305 = vector.broadcast %297 : vector<8x1xf32> to vector<8x32xf32>
    %306 = arith.subf %293, %305 : vector<8x32xf32>
    %cst_123 = arith.constant 9.99999974E-6 : f32
    %307 = vector.broadcast %cst_123 : f32 to vector<8x1xf32>
    %308 = arith.addf %304, %307 : vector<8x1xf32>
    %309 = math.rsqrt %308 : vector<8x1xf32>
    %310 = vector.broadcast %309 : vector<8x1xf32> to vector<8x32xf32>
    %311 = arith.mulf %306, %310 : vector<8x32xf32>
    %312 = vector.broadcast %31 : vector<1x32xf32> to vector<8x32xf32>
    %313 = arith.mulf %311, %312 : vector<8x32xf32>
    %314 = vector.broadcast %34 : vector<1x32xf32> to vector<8x32xf32>
    %315 = arith.addf %313, %314 : vector<8x32xf32>
    %c1_124 = arith.constant 1 : index
    %c0_125 = arith.constant 0 : index
    %c0_126 = arith.constant 0 : index
    %316 = vector.load %arg16[%c1_124, %c0_125, %c0_126] : memref<2x8x32xf32, #tpu.memory_space<vmem>>, vector<1x8x32xf32>
    %317 = vector.shape_cast %316 : vector<1x8x32xf32> to vector<8x32xf32>
    %318 = vector.shape_cast %315 : vector<8x32xf32> to vector<1x8x32xf32>
    tpu.vector_store %arg16[%c1_124, %c0_125, %c0_126], %318 {strides = array<i32>} : memref<2x8x32xf32, #tpu.memory_space<vmem>>, vector<1x8x32xf32>,
    %c1_i32 = arith.constant 1 : i32
    %319 = arith.cmpi eq, %arg0, %c1_i32 : i32
    %320 = arith.extui %319 : i1 to i32
    %c0_i32_127 = arith.constant 0 : i32
    %321 = arith.cmpi ne, %320, %c0_i32_127 : i32
    scf.if %321 {
      %c0_128 = arith.constant 0 : index
      %c0_129 = arith.constant 0 : index
      %c0_130 = arith.constant 0 : index
      %322 = vector.load %arg16[%c0_128, %c0_129, %c0_130] : memref<2x8x32xf32, #tpu.memory_space<vmem>>, vector<2x8x32xf32>
      %323 = arith.truncf %322 : vector<2x8x32xf32> to vector<2x8x32xbf16>
      %c0_131 = arith.constant 0 : index
      %c0_132 = arith.constant 0 : index
      %c0_133 = arith.constant 0 : index
      %324 = vector.load %arg15[%c0_131, %c0_132, %c0_133] : memref<2x8x32xbf16, #tpu.memory_space<vmem>>, vector<2x8x32xbf16>
      tpu.vector_store %arg15[%c0_131, %c0_132, %c0_133], %323 {strides = array<i32>} : memref<2x8x32xbf16, #tpu.memory_space<vmem>>, vector<2x8x32xbf16>,
    } else {
    }
    return
  }
  func.func @transform_0(%arg0: i32) -> (i32, i32, i32) {
    %c0_i32 = arith.constant 0 : i32
    %c0_i32_0 = arith.constant 0 : i32
    %c0_i32_1 = arith.constant 0 : i32
    %c0_i32_2 = arith.constant 0 : i32
    return %c0_i32, %c0_i32_0, %c0_i32_1 : i32, i32, i32
  }
  func.func @transform_1(%arg0: i32) -> (i32, i32) {
    %c0_i32 = arith.constant 0 : i32
    %c0_i32_0 = arith.constant 0 : i32
    %c0_i32_1 = arith.constant 0 : i32
    return %c0_i32, %c0_i32_0 : i32, i32
  }
  func.func @transform_2(%arg0: i32) -> (i32, i32, i32) {
    %c0_i32 = arith.constant 0 : i32
    %c0_i32_0 = arith.constant 0 : i32
    %c0_i32_1 = arith.constant 0 : i32
    return %arg0, %c0_i32, %c0_i32_0 : i32, i32, i32
  }
  func.func @transform_3(%arg0: i32) -> (i32, i32, i32) {
    %c0_i32 = arith.constant 0 : i32
    %c0_i32_0 = arith.constant 0 : i32
    %c0_i32_1 = arith.constant 0 : i32
    return %arg0, %c0_i32, %c0_i32_0 : i32, i32, i32
  }
  func.func @transform_4(%arg0: i32) -> (i32, i32, i32) {
    %c0_i32 = arith.constant 0 : i32
    %c0_i32_0 = arith.constant 0 : i32
    %c0_i32_1 = arith.constant 0 : i32
    return %arg0, %c0_i32, %c0_i32_0 : i32, i32, i32
  }
  func.func @transform_5(%arg0: i32) -> (i32, i32, i32) {
    %c0_i32 = arith.constant 0 : i32
    %c0_i32_0 = arith.constant 0 : i32
    %c0_i32_1 = arith.constant 0 : i32
    return %arg0, %c0_i32, %c0_i32_0 : i32, i32, i32
  }
  func.func @transform_6(%arg0: i32) -> (i32, i32, i32) {
    %c0_i32 = arith.constant 0 : i32
    %c0_i32_0 = arith.constant 0 : i32
    %c0_i32_1 = arith.constant 0 : i32
    return %arg0, %c0_i32, %c0_i32_0 : i32, i32, i32
  }
  func.func @transform_7(%arg0: i32) -> (i32, i32, i32) {
    %c0_i32 = arith.constant 0 : i32
    %c0_i32_0 = arith.constant 0 : i32
    %c0_i32_1 = arith.constant 0 : i32
    return %arg0, %c0_i32, %c0_i32_0 : i32, i32, i32
  }
  func.func @transform_8(%arg0: i32) -> (i32, i32, i32) {
    %c0_i32 = arith.constant 0 : i32
    %c0_i32_0 = arith.constant 0 : i32
    %c0_i32_1 = arith.constant 0 : i32
    return %arg0, %c0_i32, %c0_i32_0 : i32, i32, i32
  }
  func.func @transform_9(%arg0: i32) -> (i32, i32, i32) {
    %c0_i32 = arith.constant 0 : i32
    %c0_i32_0 = arith.constant 0 : i32
    %c0_i32_1 = arith.constant 0 : i32
    return %arg0, %c0_i32, %c0_i32_0 : i32, i32, i32
  }
  func.func @transform_10(%arg0: i32) -> (i32, i32, i32) {
    %c0_i32 = arith.constant 0 : i32
    %c0_i32_0 = arith.constant 0 : i32
    %c0_i32_1 = arith.constant 0 : i32
    return %arg0, %c0_i32, %c0_i32_0 : i32, i32, i32
  }
  func.func @transform_11(%arg0: i32) -> (i32, i32, i32) {
    %c0_i32 = arith.constant 0 : i32
    %c0_i32_0 = arith.constant 0 : i32
    %c0_i32_1 = arith.constant 0 : i32
    return %arg0, %c0_i32, %c0_i32_0 : i32, i32, i32
  }
  func.func @transform_12(%arg0: i32) -> (i32, i32, i32) {
    %c0_i32 = arith.constant 0 : i32
    %c0_i32_0 = arith.constant 0 : i32
    %c0_i32_1 = arith.constant 0 : i32
    return %arg0, %c0_i32, %c0_i32_0 : i32, i32, i32
  }
  func.func @transform_13(%arg0: i32) -> (i32, i32, i32) {
    %c0_i32 = arith.constant 0 : i32
    %c0_i32_0 = arith.constant 0 : i32
    %c0_i32_1 = arith.constant 0 : i32
    return %arg0, %c0_i32, %c0_i32_0 : i32, i32, i32
  }
  func.func @transform_14(%arg0: i32) -> (i32, i32, i32) {
    %c0_i32 = arith.constant 0 : i32
    %c0_i32_0 = arith.constant 0 : i32
    %c0_i32_1 = arith.constant 0 : i32
    %c0_i32_2 = arith.constant 0 : i32
    return %c0_i32, %c0_i32_0, %c0_i32_1 : i32, i32, i32
  }
}

</mosaic_0001>

<bundles_post_ra>
// kernel: transformer_forward.3
= control target key start
LH: loop header
LB: loop body
LE: loop exit
PB: predicated region body
PF: predicated region fallthrough
CT: control target
= control target key end

     0   :  { %v115_v0 = vmov 0.0   ;;  %vm116_vm0 = vmmov 0   ;;  %vm44_vm1 = vcmask 261120   ;;  %v23_v4 = vlaneseq  ;;  %s155_s1 = inlined_call_operand.vmem [shape: bf16[32,128], index: 1, kind: input, shape index: {}]   ;;  %s156_s0 = inlined_call_operand.vmem [shape: bf16[16,32], index: 0, kind: input, shape index: {}]   ;;  %s157_s2 = inlined_call_operand.vmem [shape: bf16[1,128], index: 2, kind: input, shape index: {}]   ;;  %s158_s3 = inlined_call_operand.vmem [shape: f32[16,128], index: 3, kind: output, shape index: {}]  }
   0x1   :  { %102 = vmatprep.subr.bf16.mxu0 %v115_v0  ;;  %v112_v1 = vld [vmem:[%s155_s1] sm:$0xff]   ;;  %106 = vmatprep.mubr.msk.bf16.mxu0 %vm116_vm0, %v115_v0  ;;  %v113_v2 = vld [vmem:[%s155_s1 + $0x8] sm:$0xff]  }
   0x2   :  { %103 = vmatpush3.bf16.msra.mxu0 %v112_v1  ;;  %v114_v3 = vld [vmem:[%s156_s0] sm:$0xff]   ;;  %v24_v5 = vshrl.u32 %v23_v4, 7 }
   0x3   :  { %104 = vmatprep.subr.bf16.mxu0 %v115_v0  ;;  %v21_v6 = vld [vmem:[%s157_s2] sm:$0x1] }
   0x4   :  { %v22_v7 = vunpack.c.l.bf16 %v21_v6  ;;  %v25_v8 = vsub.s32 0, %v24_v5 }
   0x6   :  { %105 = vmatpush3.bf16.msra.mxu0 %v113_v2  ;;  %v26_v9 = vrot.slane %v22_v7, %v25_v8 }
   0x9   :  { %107 = vmatmul.mubr.msk.bf16.vlgmr.msra.gmra.mrb[0].mxu0 %vm44_vm1, %v114_v3 }
  0xdc   :  { %v82_v10 = vpop.f32.mrb[0].mxu0 }
  0xdd   :  { %v83_v11 = vadd.f32 %v82_v10, %v26_v9  ;;  %v108_v12 = vpop.f32.mrb[1].mxu0 }
  0xde   :  { %v85_v13 = vpop.f32.mrb[2].mxu0 }
  0xdf   :  { %89 = vst [vmem:[%s158_s3] sm:$0xff] %v83_v11  ;;  %v86_v14 = vadd.f32 %v85_v13, %v26_v9  ;;  %v109_v15 = vpop.f32.mrb[3].mxu0 }
  0xe1   :  { %90 = vst [vmem:[%s158_s3 + $0x8] sm:$0xff] %v86_v14 }

// kernel: transformer_forward.2
= control target key start
LH: loop header
LB: loop body
LE: loop exit
PB: predicated region body
PF: predicated region fallthrough
CT: control target
= control target key end

     0   :  { %s2728_s29 = smov 0   ;;  %s3157_s0 = inlined_call_operand.vmem [shape: bf16[2,8,32], index: 0, kind: input, shape index: {}]   ;;  %s3158_s1 = inlined_call_operand.vmem [shape: bf16[8,32], index: 1, kind: input, shape index: {}]   ;;  %s3159_s2 = inlined_call_operand.vmem [shape: bf16[2,32,96], index: 2, kind: input, shape index: {}]   ;;  %s3160_s3 = inlined_call_operand.vmem [shape: bf16[2,1,96], index: 3, kind: input, shape index: {}]   ;;  %s3161_s4 = inlined_call_operand.vmem [shape: bf16[2,32,32], index: 4, kind: input, shape index: {}]   ;;  %s3162_s5 = inlined_call_operand.vmem [shape: bf16[2,1,32], index: 5, kind: input, shape index: {}]   ;;  %s3163_s6 = inlined_call_operand.vmem [shape: bf16[2,1,32], index: 6, kind: input, shape index: {}]   ;;  %s3164_s7 = inlined_call_operand.vmem [shape: bf16[2,1,32], index: 7, kind: input, shape index: {}]   ;;  %s3165_s8 = inlined_call_operand.vmem [shape: bf16[2,32,64], index: 8, kind: input, shape index: {}]   ;;  %s3166_s9 = inlined_call_operand.vmem [shape: bf16[2,1,64], index: 9, kind: input, shape index: {}]   ;;  %s3167_s10 = inlined_call_operand.vmem [shape: bf16[2,64,32], index: 10, kind: input, shape index: {}]   ;;  %s3168_s11 = inlined_call_operand.vmem [shape: bf16[2,1,32], index: 11, kind: input, shape index: {}]   ;;  %s3169_s12 = inlined_call_operand.vmem [shape: bf16[2,1,32], index: 12, kind: input, shape index: {}]   ;;  %s3170_s13 = inlined_call_operand.vmem [shape: bf16[2,1,32], index: 13, kind: input, shape index: {}]   ;;  %s3171_s14 = inlined_call_operand.vmem [shape: bf16[2,8,32], index: 14, kind: output, shape index: {}]  }
   0x1   :  { %3179 = sst [smem:[#allocation6_spill]] %s3158_s1 }
   0x2   :  { %3180 = sst [smem:[#allocation7_spill]] %s3159_s2 }
   0x3   :  { %3181 = sst [smem:[#allocation8_spill]] %s3161_s4 }
   0x4   :  { %3182 = sst [smem:[#allocation9_spill]] %s3171_s14 }
   0x5 LB: > { %3183 = sst [smem:[#allocation4_spill]] %s2635_s29  ;;  %s2734_s30 = sadd.s32 4294967295, %s2635_s29   ;;  %s2635_s29 = sphi %s2728_s29, %s24_s29  }
   0x6   : > { %p2272_p0 = scmp.ge.s32.totalorder %s2635_s29, 1  ;;  %p501_p1 = scmp.lt.s32.totalorder %s2635_s29, 3 }
   0x8   : > { %p502_p2 = pnand %p2272_p0, %p501_p1 }
   0xa   : > { %505 = sbr.rel (%p502_p2) target bundleno = 4401 (0x1131), region = 76 }
  0x11   : > { %p581_p3 = scmp.lt.s32.totalorder %s2734_s30, 1  ;;  %s3184_s2 = sld [smem:[#allocation7_spill]] }
  0x12   : > { %s3185_s4 = sld [smem:[#allocation8_spill]]  ;;  %p2281_p4 = scmp.ne.s32.totalorder %s2734_s30, 0 }
  0x13   : > { %s2740_s15 = scalar_select %p581_p3, %s2734_s30, 1 }
  0x14   : > { %629 = sbr.rel (%p2281_p4) target bundleno = 32 (0x20), region = 80  ;;  %v2324_v0 = vld [vmem:[%s3157_s0] sm:$0xff] (!%p2281_p4)   ;;  %s3187_s27 = sld [smem:[#allocation6_spill]] (!%p2281_p4)  ;;  %vm640_vm0 = vcmask (!%p2281_p4), 261120  }
  0x15   : > { %s2319_s16 = sshll.u32 %s2740_s15, 4  ;;  %v2325_v2 = vunpack.c.l.bf16 (!%p2281_p4), %v2324_v0  ;;  %v2326_v4 = vunpack.c.h.bf16 (!%p2281_p4), %v2324_v0 }
  0x17   : > { %s2750_s22 = scalar_lea.vmem %s3184_s2, %s2319_s16  ;;  %s2772_s2 = scalar_lea.vmem %s3165_s8, %s2319_s16  ;;  %v634_v5 = vmul.f32 (!%p2281_p4), 5.656854, %v2325_v2  ;;  %v635_v6 = vmul.f32 (!%p2281_p4), 5.656854, %v2326_v4 }
  0x18   : > { %s2755_s25 = scalar_lea.vmem %s3185_s4, %s2319_s16  ;;  %s610_s4 = scalar_lea.vmem %s3166_s9, %s2740_s15 }
  0x19   : > { %3186 = sst [smem:[#allocation5_spill]] %s2755_s25  ;;  %s2322_s25 = sshll.u32 %s2740_s15, 5 }
  0x1a   : > { %s2782_s28 = scalar_lea.vmem %s3167_s10, %s2322_s25  ;;  %v636_v1 = vld [vmem:[%s3187_s27] sm:$0xf] (!%p2281_p4) }
  0x1b   : > { %v637_v3 = vunpack.c.l.bf16 %v636_v1 }
  0x1d   : > { %v638_v7 = vadd.f32 %v637_v3, %v634_v5  ;;  %v639_v8 = vadd.f32 %v637_v3, %v635_v6 }
  0x1f   : > { %641 = vst.msk [vmem:[#allocation2] sm:$0xff] %vm640_vm0, %v638_v7  ;;  %642 = vst.msk [vmem:[#allocation2 + $0x8] sm:$0xff] %vm640_vm0, %v639_v8 }
  0x20 PF: > { %v2804_v9 = vld [vmem:[%s2750_s22] sm:$0xff]   ;;  %v2637_v10 = vmov 0.0   ;;  %v2810_v11 = vld [vmem:[%s2750_s22 + $0x8] sm:$0xff]   ;;  %vm2638_vm1 = vmmov 0   ;;  %vm697_vm2 = vcmask 261120   ;;  %v681_v14 = vlaneseq  ;;  %s3188_s14 = scalar_lea.vmem %s3160_s3, %s2740_s15  ;;  %s2639_s29 = smov 96  }
  0x21   : > { %2387 = vmatprep.subr.bf16.mxu1 %v2637_v10  ;;  %2401 = vmatprep.subr.bf16.mxu0 %v2637_v10  ;;  %v647_v16 = vld [vmem:[%s3188_s14] sm:$0x1]  ;;  %s2640_s18 = smov 120   ;;  %s2641_s16 = smov 88   ;;  %vm747_vm3 = vcmask 64512   ;;  %vm811_vm4 = vcmask 1043456  }
  0x22   : > { %2388 = vmatpush3.bf16.msra.mxu1 %v2804_v9  ;;  %2391 = vmatprep.mubr.msk.bf16.mxu1 %vm2638_vm1, %v2637_v10  ;;  %v682_v15 = vshrl.u32 %v681_v14, 7  ;;  %v648_v17 = vunpack.c.l.bf16 %v647_v16  ;;  %s2642_s21 = smov 80   ;;  %s2643_s23 = smov 112   ;;  %vm971_vm5 = vcmask 130112   ;;  %vm1087_vm6 = vcmask 195712  }
  0x23   : > { %2389 = vmatprep.subr.bf16.mxu1 %v2637_v10  ;;  %2403 = vmatprep.mubr.msk.bf16.mxu0 %vm2638_vm1, %v2637_v10  ;;  %s2644_s24 = smov 72   ;;  %s2645_s25 = smov 104   ;;  %vm1203_vm7 = vcmask 261312   ;;  %vm1381_vm8 = vcmask 523264  }
  0x24   : > { %v2831_v18 = vsub.s32 0, %v682_v15  ;;  %s2646_s26 = smov 56   ;;  %s2647_s27 = smov 64  }
  0x25   : > { %s2648_s19 = smov 40   ;;  %s3178_s22 = smov 48  }
  0x26   : > { %v2814_v12 = vld [vmem:[#allocation2] sm:$0xff]  ;;  %2390 = vmatpush3.bf16.msra.mxu1 %v2810_v11  ;;  %v2834_v19 = vrot.slane %v648_v17, %v2831_v18  ;;  %s3189_s14 = sld [smem:[#allocation5_spill]]  ;;  %s3177_s1 = smov 8  }
  0x27   : > { %v680_v13 = vpack.c.bf16 %v2814_v12, %v2814_v12  ;;  %2395 = vmatprep.subr.bf16.mxu1 %v2637_v10  ;;  %s3176_s20 = smov 16   ;;  %s3175_s17 = smov 24  }
  0x28   : > { %p2316_p5 = scmp.ne.s32.totalorder %s2734_s30, 1 }
  0x29   : > { %2392 = vmatmul.mubr.msk.bf16.vlgmr.msra.gmra.mrb[0].mxu1 %vm697_vm2, %v680_v13  ;;  %vm2130_vm9 = vcmask (!%p2316_p5), 257024  }
  0x2a   : > { %2397 = vmatprep.mubr.msk.bf16.mxu1 %vm2638_vm1, %v2637_v10 }
  0xfc   : > { %v735_v20 = vpop.f32.mrb[0].mxu1 }
  0xfd   : > { %v736_v21 = vadd.f32 %v735_v20, %v2834_v19  ;;  %v2393_v22 = vpop.f32.mrb[1].mxu1 }
  0xfe   : > { %v738_v23 = vpop.f32.mrb[2].mxu1 }
  0xff   : > { %v741_v24 = vmul.f32 0.35355338, %v736_v21  ;;  %v2837_v25 = vpack.c.bf16 %v736_v21, %v736_v21  ;;  %v2394_v26 = vpop.f32.mrb[3].mxu1 }
 0x101   : > { %v742_v27 = vpack.c.bf16 %v741_v24, %v741_v24  ;;  %745 = vrot.lane.b32.xlu0 %v2837_v25, %s2639_s29 }
 0x103   : > { %857 = vrot.lane.b32.xlu1 %v742_v27, %s2640_s18 }
 0x105   : > { %859 = vrot.lane.b32.xlu0 %v2837_v25, %s2641_s16 }
 0x107   : > { %975 = vrot.lane.b32.xlu1 %v2837_v25, %s2642_s21 }
 0x109   : > { %973 = vrot.lane.b32.xlu0 %v742_v27, %s2643_s23 }
 0x10b   : > { %1091 = vrot.lane.b32.xlu1 %v2837_v25, %s2644_s24 }
 0x10d   : > { %1089 = vrot.lane.b32.xlu0 %v742_v27, %s2645_s25 }
 0x173   : > { %v746_v28 = vpop.permute.xlu0 %745 }
 0x174   : > { %v752_v29 = vsel %vm747_vm3, %v746_v28, 0 }
 0x175   : > { %2396 = vmatpush3.bf16.xpose.msra.mxu1 %v752_v29  ;;  %v858_v31 = vpop.permute.xlu1 %857 }
 0x176   : > { %2407 = vmatprep.subr.bf16.mxu1 %v2637_v10 }
 0x177   : > { %v860_v30 = vpop.permute.xlu0 %859 }
 0x178   : > { %v865_v32 = vsel %vm747_vm3, %v860_v30, 0 }
 0x179   : > { %v976_v33 = vpop.permute.xlu1 %975 }
 0x17a   : > { %v981_v34 = vsel %vm747_vm3, %v976_v33, 0 }
 0x17b   : > { %v974_v36 = vpop.permute.xlu0 %973 }
 0x17c   : > { %2398 = vmatmul.mubr.msk.bf16.vlgmr.msra.gmra.mrb[4].mxu1 %vm747_vm3, %v742_v27 }
 0x17d   : > { %2408 = vmatpush3.bf16.xpose.msra.mxu1 %v865_v32  ;;  %2409 = vmatprep.mubr.msk.bf16.mxu1 %vm2638_vm1, %v2637_v10  ;;  %v1092_v35 = vpop.permute.xlu1 %1091 }
 0x17e   : > { %2419 = vmatprep.subr.bf16.mxu1 %v2637_v10  ;;  %v1097_v37 = vsel %vm747_vm3, %v1092_v35, 0 }
 0x17f   : > { %v1090_v38 = vpop.permute.xlu0 %1089 }
 0x184   : > { %2410 = vmatmul.mubr.msk.bf16.vlgmr.msra.gmra.mrb[8].mxu1 %vm747_vm3, %v858_v31 }
 0x185   : > { %2420 = vmatpush3.bf16.xpose.msra.mxu1 %v981_v34  ;;  %2421 = vmatprep.mubr.msk.bf16.mxu1 %vm2638_vm1, %v2637_v10 }
 0x186   : > { %2431 = vmatprep.subr.bf16.mxu1 %v2637_v10 }
 0x18c   : > { %2422 = vmatmul.mubr.msk.bf16.vlgmr.msra.gmra.mrb[12].mxu1 %vm747_vm3, %v974_v36 }
 0x18d   : > { %2432 = vmatpush3.bf16.xpose.msra.mxu1 %v1097_v37  ;;  %2433 = vmatprep.mubr.msk.bf16.mxu1 %vm2638_vm1, %v2637_v10 }
 0x18e   : > { %2443 = vmatprep.subr.bf16.mxu1 %v2637_v10 }
 0x194   : > { %2434 = vmatmul.mubr.msk.bf16.vlgmr.msra.gmra.mrb[16].mxu1 %vm747_vm3, %v1090_v38 }
 0x195   : > { %2447 = vmatprep.mubr.msk.bf16.mxu1 %vm2638_vm1, %v2637_v10 }
 0x24f   : > { %v788_v39 = vpop.f32.mrb[4].mxu1 }
 0x250   : > { %v2399_v40 = vpop.f32.mrb[5].mxu1  ;;  %v794_v41 = vsel %vm747_vm3, %v788_v39, -inf }
 0x251   : > { %795 = vmax.xlane.f32.xlu1 %v794_v41  ;;  %v791_v42 = vpop.f32.mrb[6].mxu1 }
 0x252   : > { %v2400_v43 = vpop.f32.mrb[7].mxu1 }
 0x257   : > { %v901_v44 = vpop.f32.mrb[8].mxu1 }
 0x258   : > { %v2411_v45 = vpop.f32.mrb[9].mxu1  ;;  %v907_v46 = vsel %vm747_vm3, %v901_v44, -inf }
 0x259   : > { %908 = vmax.xlane.f32.xlu0 %v907_v46  ;;  %v904_v47 = vpop.f32.mrb[10].mxu1 }
 0x25a   : > { %v2412_v48 = vpop.f32.mrb[11].mxu1 }
 0x25f   : > { %v1017_v49 = vpop.f32.mrb[12].mxu1 }
 0x260   : > { %v2423_v50 = vpop.f32.mrb[13].mxu1  ;;  %v1023_v51 = vsel %vm747_vm3, %v1017_v49, -inf }
 0x261   : > { %1024 = vmax.xlane.f32.xlu0 %v1023_v51  ;;  %v1020_v52 = vpop.f32.mrb[14].mxu1 }
 0x262   : > { %v2424_v53 = vpop.f32.mrb[15].mxu1 }
 0x263   : > { %v2909_v53 = vld [vmem:[%s3189_s14] sm:$0xff]  }
 0x264   : > { %2444 = vmatpush3.bf16.msra.mxu1 %v2909_v53 }
 0x265   : > { %2445 = vmatprep.subr.bf16.mxu1 %v2637_v10 }
 0x267   : > { %v1133_v54 = vpop.f32.mrb[16].mxu1 }
 0x268   : > { %v2435_v55 = vpop.f32.mrb[17].mxu1  ;;  %v1139_v56 = vsel %vm747_vm3, %v1133_v54, -inf }
 0x269   : > { %1140 = vmax.xlane.f32.xlu1 %v1139_v56  ;;  %v1136_v57 = vpop.f32.mrb[18].mxu1 }
 0x26a   : > { %v2436_v58 = vpop.f32.mrb[19].mxu1 }
 0x2de   : > { %v796_v59 = vpop.xlane.xlu1 %795 }
 0x2df   : > { %v797_v60 = vsub.f32 %v788_v39, %v796_v59 }
 0x2e1   : > { %v798_v61 = vmul.f32 1.442695, %v797_v60 }
 0x2e3   : > { %2589 = vpow2.f32 %v798_v61 }
 0x2e6   : > { %v909_v62 = vpop.xlane.xlu0 %908 }
 0x2e7   : > { %v910_v63 = vsub.f32 %v901_v44, %v909_v62 }
 0x2e9   : > { %v911_v0 = vmul.f32 1.442695, %v910_v63 }
 0x2eb   : > { %2591 = vpow2.f32 %v911_v0 }
 0x2ed   : > { %v2590_v1 = vpop.eup %2589 }
 0x2ee   : > { %v1025_v2 = vpop.xlane.xlu0 %1024  ;;  %v800_v3 = vsel %vm747_vm3, %v2590_v1, 0.0 }
 0x2ef   : > { %v1026_v4 = vsub.f32 %v1017_v49, %v1025_v2  ;;  %801 = vadd.xlane.f32.xlu0 %v800_v3 }
 0x2f1   : > { %v1027_v5 = vmul.f32 1.442695, %v1026_v4 }
 0x2f3   : > { %2593 = vpow2.f32 %v1027_v5 }
 0x2f5   : > { %v2592_v6 = vpop.eup %2591 }
 0x2f6   : > { %v913_v7 = vsel %vm747_vm3, %v2592_v6, 0.0  ;;  %v1141_v14 = vpop.xlane.xlu1 %1140 }
 0x2f7   : > { %914 = vadd.xlane.f32.xlu1 %v913_v7  ;;  %v1142_v15 = vsub.f32 %v1133_v54, %v1141_v14  ;;  %v2913_v54 = vld [vmem:[%s3189_s14 + $0x8] sm:$0xff]  }
 0x2f8   : > { %2446 = vmatpush3.bf16.msra.mxu1 %v2913_v54 }
 0x2f9   : > { %v1143_v16 = vmul.f32 1.442695, %v1142_v15  ;;  %2459 = vmatprep.subr.bf16.mxu1 %v2637_v10 }
 0x2fb   : > { %2595 = vpow2.f32 %v1143_v16 }
 0x2fd   : > { %v2594_v8 = vpop.eup %2593 }
 0x2fe   : > { %v1029_v13 = vsel %vm747_vm3, %v2594_v8, 0.0 }
 0x2ff   : > { %1030 = vadd.xlane.f32.xlu0 %v1029_v13 }
 0x305   : > { %v2596_v17 = vpop.eup %2595 }
 0x306   : > { %v1145_v20 = vsel %vm747_vm3, %v2596_v17, 0.0 }
 0x308   : > { %919 = vrot.lane.b32.xlu1 %v2837_v25, %s2646_s26 }
 0x315   : > { %806 = vrot.lane.b32.xlu0 %v2837_v25, %s2647_s27 }
 0x319   : > { %1151 = vrot.lane.b32.xlu0 %v2837_v25, %s2648_s19 }
 0x32c   : > { %1146 = vadd.xlane.f32.xlu1 %v1145_v20 }
 0x33d   : > { %1035 = vrot.lane.b32.xlu1 %v2837_v25, %s3178_s22  ;;  %s3192_s22 = scalar_lea.vmem %s3164_s7, %s2740_s15 }
 0x37c   : > { %v802_v21 = vpop.xlane.xlu0 %801 }
 0x37d   : > { %2597 = vrcp.f32 %v802_v21 }
 0x384   : > { %v915_v22 = vpop.xlane.xlu1 %914 }
 0x385   : > { %2599 = vrcp.f32 %v915_v22 }
 0x387   : > { %v2598_v23 = vpop.eup %2597 }
 0x388   : > { %v804_v26 = vmul.f32 %v2598_v23, %v2590_v1  ;;  %v920_v29 = vpop.permute.xlu1 %919 }
 0x389   : > { %v925_v32 = vsel %vm811_vm4, %v920_v29, 0 }
 0x38a   : > { %v805_v30 = vpack.c.bf16 %v804_v26, %v804_v26  ;;  %v2939_v26 = vld [vmem:[%s2772_s2] sm:$0xff]  }
 0x38c   : > { %v1031_v24 = vpop.xlane.xlu0 %1030 }
 0x38d   : > { %2601 = vrcp.f32 %v1031_v24 }
 0x38f   : > { %v2600_v31 = vpop.eup %2599 }
 0x390   : > { %v807_v27 = vpop.permute.xlu0 %806  ;;  %v917_v25 = vmul.f32 %v2600_v31, %v2592_v6 }
 0x391   : > { %v813_v28 = vsel %vm811_vm4, %v807_v27, 0  ;;  %v2949_v27 = vld [vmem:[%s2782_s28] sm:$0xff]  }
 0x392   : > { %2402 = vmatpush3.bf16.msra.mxu0 %v813_v28  ;;  %v918_v33 = vpack.c.bf16 %v917_v25, %v917_v25  ;;  %v2953_v28 = vld [vmem:[%s2782_s28 + $0x8] sm:$0xff]   ;;  %v657_v25 = vld [vmem:[%s3192_s22] sm:$0x1] }
 0x393   : > { %2413 = vmatprep.subr.bf16.mxu0 %v2637_v10 }
 0x394   : > { %v1152_v39 = vpop.permute.xlu0 %1151 }
 0x395   : > { %2404 = vmatmul.mubr.msk.bf16.vlgmr.msra.gmra.mrb[0].mxu0 %vm747_vm3, %v805_v30  ;;  %v1157_v41 = vsel %vm811_vm4, %v1152_v39, 0 }
 0x396   : > { %2414 = vmatpush3.bf16.msra.mxu0 %v925_v32  ;;  %2415 = vmatprep.mubr.msk.bf16.mxu0 %vm2638_vm1, %v2637_v10 }
 0x397   : > { %2425 = vmatprep.subr.bf16.mxu0 %v2637_v10  ;;  %v2602_v34 = vpop.eup %2601 }
 0x398   : > { %v1033_v36 = vmul.f32 %v2602_v34, %v2594_v8  ;;  %v658_v34 = vunpack.c.l.bf16 %v657_v25 }
 0x39a   : > { %v1034_v40 = vpack.c.bf16 %v1033_v36, %v1033_v36 }
 0x39d   : > { %2416 = vmatmul.mubr.msk.bf16.vlgmr.msra.gmra.mrb[4].mxu0 %vm747_vm3, %v918_v33 }
 0x39e   : > { %2427 = vmatprep.mubr.msk.bf16.mxu0 %vm2638_vm1, %v2637_v10 }
 0x3b9   : > { %v1147_v35 = vpop.xlane.xlu1 %1146 }
 0x3ba   : > { %2603 = vrcp.f32 %v1147_v35 }
 0x3bd   : > { %v1036_v37 = vpop.permute.xlu1 %1035 }
 0x3be   : > { %v1041_v38 = vsel %vm811_vm4, %v1036_v37, 0 }
 0x3bf   : > { %2426 = vmatpush3.bf16.msra.mxu0 %v1041_v38  ;;  %v2972_v38 = vrot.slane %v658_v34, %v2831_v18 }
 0x3c0   : > { %2437 = vmatprep.subr.bf16.mxu0 %v2637_v10 }
 0x3c2   : > { %2428 = vmatmul.mubr.msk.bf16.vlgmr.msra.gmra.mrb[8].mxu0 %vm747_vm3, %v1034_v40 }
 0x3c3   : > { %2438 = vmatpush3.bf16.msra.mxu0 %v1157_v41  ;;  %2439 = vmatprep.mubr.msk.bf16.mxu0 %vm2638_vm1, %v2637_v10 }
 0x3c4   : > { %v2604_v42 = vpop.eup %2603  ;;  %2451 = vmatprep.subr.bf16.mxu0 %v2637_v10 }
 0x3c5   : > { %v1149_v43 = vmul.f32 %v2604_v42, %v2596_v17  ;;  %v2984_v42 = vld [vmem:[#allocation2 + $0x8] sm:$0xff] }
 0x3c7   : > { %v1150_v44 = vpack.c.bf16 %v1149_v43, %v1149_v43  ;;  %v1452_v43 = vpack.c.bf16 %v2984_v42, %v2984_v42 }
 0x3ca   : > { %2440 = vmatmul.mubr.msk.bf16.vlgmr.msra.gmra.mrb[12].mxu0 %vm747_vm3, %v1150_v44  ;;  %v3000_v44 = vld [vmem:[%s2782_s28 + $0x18] sm:$0xff]  }
 0x3cb   : > { %2455 = vmatprep.mubr.msk.bf16.mxu0 %vm2638_vm1, %v2637_v10  ;;  %2452 = vmatpush3.bf16.msra.mxu0 %v2939_v26 }
 0x3cc   : > { %2453 = vmatprep.subr.bf16.mxu0 %v2637_v10 }
 0x468   : > { %v849_v45 = vpop.f32.mrb[0].mxu0 }
 0x469   : > { %855 = vst.msk [vmem:[#allocation3] sm:$0xff] %vm747_vm3, %v849_v45  ;;  %v2405_v46 = vpop.f32.mrb[1].mxu0 }
 0x46a   : > { %v852_v47 = vpop.f32.mrb[2].mxu0 }
 0x46b   : > { %v2406_v48 = vpop.f32.mrb[3].mxu0 }
 0x470   : > { %v961_v49 = vpop.f32.mrb[4].mxu0 }
 0x471   : > { %968 = vrot.lane.b32.xlu1 %v961_v49, %s3177_s1  ;;  %v2417_v50 = vpop.f32.mrb[5].mxu0 }
 0x472   : > { %v964_v51 = vpop.f32.mrb[6].mxu0 }
 0x473   : > { %v2418_v52 = vpop.f32.mrb[7].mxu0 }
 0x495   : > { %v1077_v55 = vpop.f32.mrb[8].mxu0 }
 0x496   : > { %1084 = vrot.lane.b32.xlu0 %v1077_v55, %s3176_s20  ;;  %v2429_v56 = vpop.f32.mrb[9].mxu0  ;;  %s3190_s20 = scalar_lea.vmem %s3162_s5, %s2740_s15 }
 0x497   : > { %v1080_v57 = vpop.f32.mrb[10].mxu0  ;;  %v653_v4 = vld [vmem:[%s3190_s20] sm:$0x1]  ;;  %s3191_s20 = scalar_lea.vmem %s3163_s6, %s2740_s15 }
 0x498   : > { %v2430_v58 = vpop.f32.mrb[11].mxu0  ;;  %v654_v5 = vunpack.c.l.bf16 %v653_v4  ;;  %v655_v32 = vld [vmem:[%s3191_s20] sm:$0x1]  ;;  %s3200_s20 = sld [smem:[#allocation9_spill]] (!%p2316_p5) }
 0x499   : > { %v656_v33 = vunpack.c.l.bf16 %v655_v32 }
 0x49a   : > { %v2932_v6 = vrot.slane %v654_v5, %v2831_v18 }
 0x49b   : > { %v2969_v35 = vrot.slane %v656_v33, %v2831_v18 }
 0x49d   : > { %v1193_v59 = vpop.f32.mrb[12].mxu0 }
 0x49e   : > { %1200 = vrot.lane.b32.xlu1 %v1193_v59, %s3175_s17  ;;  %v2441_v60 = vpop.f32.mrb[13].mxu0 }
 0x49f   : > { %v1196_v61 = vpop.f32.mrb[14].mxu0 }
 0x4a0   : > { %v2442_v62 = vpop.f32.mrb[15].mxu0 }
 0x4e3   : > { %v969_v63 = vpop.permute.xlu1 %968 }
 0x4e4   : > { %972 = vst.msk [vmem:[#allocation3] sm:$0xff] %vm971_vm5, %v969_v63 }
 0x508   : > { %v1085_v0 = vpop.permute.xlu0 %1084 }
 0x509   : > { %1088 = vst.msk [vmem:[#allocation3] sm:$0xff] %vm1087_vm6, %v1085_v0 }
 0x510   : > { %v1201_v1 = vpop.permute.xlu1 %1200 }
 0x511   : > { %1204 = vst.msk [vmem:[#allocation3] sm:$0xff] %vm1203_vm7, %v1201_v1 }
 0x518   : > { %v1205_v2 = vld [vmem:[#allocation3] sm:$0xff] }
 0x519   : > { %v1206_v3 = vpack.c.bf16 %v1205_v2, %v1205_v2 }
 0x51b   : > { %2448 = vmatmul.mubr.msk.bf16.vlgmr.msra.gmra.mrb[20].mxu1 %vm697_vm2, %v1206_v3 }
 0x51c   : > { %2467 = vmatprep.mubr.msk.bf16.mxu1 %vm2638_vm1, %v2637_v10  ;;  %2460 = vmatpush3.bf16.msra.mxu1 %v2949_v27 }
 0x51d   : > { %2461 = vmatprep.subr.bf16.mxu1 %v2637_v10 }
 0x520   : > { %2462 = vmatpush3.bf16.msra.mxu1 %v2953_v28 }
 0x521   : > { %2463 = vmatprep.subr.bf16.mxu1 %v2637_v10 }
 0x5ee   : > { %v1260_v7 = vpop.f32.mrb[20].mxu1 }
 0x5ef   : > { %v1261_v8 = vadd.f32 %v1260_v7, %v2932_v6  ;;  %v2449_v13 = vpop.f32.mrb[21].mxu1 }
 0x5f0   : > { %v1263_v14 = vpop.f32.mrb[22].mxu1 }
 0x5f1   : > { %v2450_v15 = vpop.f32.mrb[23].mxu1  ;;  %v1266_v16 = vadd.f32 %v1261_v8, %v2814_v12  ;;  %v2944_v12 = vld [vmem:[%s2772_s2 + $0x8] sm:$0xff]   ;;  %s3199_s2 = scalar_lea.vmem %s3170_s13, %s2740_s15 }
 0x5f2   : > { %2454 = vmatpush3.bf16.msra.mxu0 %v2944_v12 }
 0x5f3   : > { %v1267_v17 = vsel %vm697_vm2, %v1266_v16, 0.0  ;;  %2471 = vmatprep.subr.bf16.mxu0 %v2637_v10 }
 0x5f4   : > { %1268 = vadd.xlane.f32.xlu0 %v1267_v17 }
 0x681   : > { %v1269_v20 = vpop.xlane.xlu0 %1268 }
 0x682   : > { %v1271_v21 = vmul.f32 0.03125, %v1269_v20 }
 0x684   : > { %v1272_v22 = vsub.f32 %v1266_v16, %v1271_v21 }
 0x686   : > { %v1273_v23 = vmul.f32 %v1272_v22, %v1272_v22 }
 0x688   : > { %v1274_v24 = vsel %vm697_vm2, %v1273_v23, 0.0 }
 0x689   : > { %1275 = vadd.xlane.f32.xlu1 %v1274_v24 }
 0x716   : > { %v1276_v29 = vpop.xlane.xlu1 %1275 }
 0x717   : > { %v1277_v30 = vmul.f32 0.03125, %v1276_v29 }
 0x719   : > { %v1278_v31 = vadd.f32 1e-05, %v1277_v30 }
 0x71b   : > { %2605 = vrsqrt.f32 %v1278_v31 }
 0x725   : > { %v2606_v36 = vpop.eup %2605 }
 0x726   : > { %v1280_v37 = vmul.f32 %v2606_v36, %v1272_v22 }
 0x728   : > { %v1285_v39 = vmul.f32 %v2969_v35, %v1280_v37 }
 0x72a   : > { %v2976_v40 = vadd.f32 %v2972_v38, %v1285_v39 }
 0x72c   : > { %v1291_v41 = vpack.c.bf16 %v2976_v40, %v2976_v40 }
 0x72e   : > { %2456 = vmatmul.mubr.msk.bf16.vlgmr.msra.gmra.mrb[16].mxu0 %vm697_vm2, %v1291_v41 }
 0x72f   : > { %2472 = vmatpush3.bf16.msra.mxu0 %v2804_v9  ;;  %2475 = vmatprep.mubr.msk.bf16.mxu0 %vm2638_vm1, %v2637_v10  ;;  %v2995_v9 = vld [vmem:[%s2782_s28 + $0x10] sm:$0xff]   ;;  %s3194_s28 = smov 8  }
 0x730   : > { %2473 = vmatprep.subr.bf16.mxu0 %v2637_v10  ;;  %2464 = vmatpush3.bf16.msra.mxu1 %v2995_v9 }
 0x731   : > { %2465 = vmatprep.subr.bf16.mxu1 %v2637_v10 }
 0x733   : > { %2474 = vmatpush3.bf16.msra.mxu0 %v2810_v11  ;;  %v663_v11 = vld [vmem:[%s610_s4] sm:$0x1]  ;;  %s3193_s4 = smov 48  }
 0x734   : > { %2479 = vmatprep.subr.bf16.mxu0 %v2637_v10  ;;  %2466 = vmatpush3.bf16.msra.mxu1 %v3000_v44  ;;  %v664_v45 = vunpack.c.l.bf16 %v663_v11 }
 0x735   : > { %2485 = vmatprep.subr.bf16.mxu1 %v2637_v10 }
 0x736   : > { %2476 = vmatmul.mubr.msk.bf16.vlgmr.msra.gmra.mrb[20].mxu0 %vm697_vm2, %v1452_v43  ;;  %v3010_v46 = vrot.slane %v664_v45, %v2831_v18 }
 0x737   : > { %2481 = vmatprep.mubr.msk.bf16.mxu0 %vm2638_vm1, %v2637_v10 }
 0x801   : > { %v1345_v47 = vpop.f32.mrb[16].mxu0 }
 0x802   : > { %v1346_v48 = vadd.f32 %v1345_v47, %v3010_v46  ;;  %v2457_v49 = vpop.f32.mrb[17].mxu0 }
 0x803   : > { %v1348_v50 = vpop.f32.mrb[18].mxu0 }
 0x804   : > { %v1351_v51 = vmax.f32 %v1346_v48, 0.0  ;;  %v2458_v52 = vpop.f32.mrb[19].mxu0 }
 0x806   : > { %v1352_v55 = vpack.c.bf16 %v1351_v51, %v1351_v51 }
 0x808   : > { %2468 = vmatmul.mubr.msk.bf16.vlgmr.msra.gmra.mrb[24].mxu1 %vm1381_vm8, %v1352_v55 }
 0x809   : > { %v1490_v56 = vpop.f32.mrb[20].mxu0  ;;  %2487 = vmatprep.mubr.msk.bf16.mxu1 %vm2638_vm1, %v2637_v10 }
 0x80a   : > { %v1491_v57 = vadd.f32 %v1490_v56, %v2834_v19  ;;  %v2477_v58 = vpop.f32.mrb[21].mxu0 }
 0x80b   : > { %v1493_v59 = vpop.f32.mrb[22].mxu0 }
 0x80c   : > { %v1496_v60 = vmul.f32 0.35355338, %v1491_v57  ;;  %v3017_v61 = vpack.c.bf16 %v1491_v57, %v1491_v57  ;;  %v2478_v62 = vpop.f32.mrb[23].mxu0 }
 0x80e   : > { %1612 = vrot.lane.b32.xlu1 %v3017_v61, %s2641_s16  ;;  %1500 = vrot.lane.b32.xlu0 %v3017_v61, %s2639_s29  ;;  %v1497_v63 = vpack.c.bf16 %v1496_v60, %v1496_v60  ;;  %s3195_s29 = smov 16  }
 0x812   : > { %1727 = vrot.lane.b32.xlu1 %v3017_v61, %s2642_s21  ;;  %1610 = vrot.lane.b32.xlu0 %v1497_v63, %s2640_s18  ;;  %s3196_s18 = smov 24  }
 0x816   : > { %1842 = vrot.lane.b32.xlu1 %v3017_v61, %s2644_s24  ;;  %1725 = vrot.lane.b32.xlu0 %v1497_v63, %s2643_s23  ;;  %s3197_s23 = scalar_lea.vmem %s3168_s11, %s2740_s15 }
 0x81a   : > { %1840 = vrot.lane.b32.xlu0 %v1497_v63, %s2645_s25 }
 0x880   : > { %v1501_v19 = vpop.permute.xlu0 %1500  ;;  %v1613_v1 = vpop.permute.xlu1 %1612 }
 0x881   : > { %v1506_v0 = vsel %vm747_vm3, %v1501_v19, 0  ;;  %v1618_v2 = vsel %vm747_vm3, %v1613_v1, 0 }
 0x882   : > { %2480 = vmatpush3.bf16.xpose.msra.mxu0 %v1506_v0 }
 0x883   : > { %2491 = vmatprep.subr.bf16.mxu0 %v2637_v10 }
 0x884   : > { %v1728_v3 = vpop.permute.xlu1 %1727  ;;  %v1611_v4 = vpop.permute.xlu0 %1610 }
 0x885   : > { %v1733_v5 = vsel %vm747_vm3, %v1728_v3, 0 }
 0x888   : > { %v1843_v7 = vpop.permute.xlu1 %1842  ;;  %v1726_v8 = vpop.permute.xlu0 %1725 }
 0x889   : > { %2482 = vmatmul.mubr.msk.bf16.vlgmr.msra.gmra.mrb[24].mxu0 %vm747_vm3, %v1497_v63  ;;  %v1848_v13 = vsel %vm747_vm3, %v1843_v7, 0 }
 0x88a   : > { %2492 = vmatpush3.bf16.xpose.msra.mxu0 %v1618_v2  ;;  %2493 = vmatprep.mubr.msk.bf16.mxu0 %vm2638_vm1, %v2637_v10 }
 0x88b   : > { %2503 = vmatprep.subr.bf16.mxu0 %v2637_v10 }
 0x88c   : > { %v1841_v14 = vpop.permute.xlu0 %1840 }
 0x891   : > { %2494 = vmatmul.mubr.msk.bf16.vlgmr.msra.gmra.mrb[28].mxu0 %vm747_vm3, %v1611_v4 }
 0x892   : > { %2504 = vmatpush3.bf16.xpose.msra.mxu0 %v1733_v5  ;;  %2505 = vmatprep.mubr.msk.bf16.mxu0 %vm2638_vm1, %v2637_v10 }
 0x893   : > { %2515 = vmatprep.subr.bf16.mxu0 %v2637_v10 }
 0x899   : > { %2506 = vmatmul.mubr.msk.bf16.vlgmr.msra.gmra.mrb[32].mxu0 %vm747_vm3, %v1726_v8 }
 0x89a   : > { %2516 = vmatpush3.bf16.xpose.msra.mxu0 %v1848_v13  ;;  %2517 = vmatprep.mubr.msk.bf16.mxu0 %vm2638_vm1, %v2637_v10 }
 0x89b   : > { %2527 = vmatprep.subr.bf16.mxu0 %v2637_v10 }
 0x8a1   : > { %2518 = vmatmul.mubr.msk.bf16.vlgmr.msra.gmra.mrb[36].mxu0 %vm747_vm3, %v1841_v14 }
 0x8a2   : > { %2528 = vmatpush3.bf16.msra.mxu0 %v2909_v53  ;;  %2531 = vmatprep.mubr.msk.bf16.mxu0 %vm2638_vm1, %v2637_v10 }
 0x8a3   : > { %2529 = vmatprep.subr.bf16.mxu0 %v2637_v10 }
 0x8a6   : > { %2530 = vmatpush3.bf16.msra.mxu0 %v2913_v54 }
 0x8a7   : > { %2543 = vmatprep.subr.bf16.mxu0 %v2637_v10 }
 0x8db   : > { %v3054_v15 = vpop.f32.mrb[24].mxu1 }
 0x8dc   : > { %v2469_v16 = vpop.f32.mrb[25].mxu1 }
 0x8dd   : > { %v1422_v17 = vpop.f32.mrb[26].mxu1 }
 0x8de   : > { %v2470_v20 = vpop.f32.mrb[27].mxu1 }
 0x95c   : > { %v1542_v21 = vpop.f32.mrb[24].mxu0 }
 0x95d   : > { %v2483_v22 = vpop.f32.mrb[25].mxu0  ;;  %v1548_v23 = vsel %vm747_vm3, %v1542_v21, -inf }
 0x95e   : > { %1549 = vmax.xlane.f32.xlu1 %v1548_v23  ;;  %v1545_v53 = vpop.f32.mrb[26].mxu0 }
 0x95f   : > { %v2484_v24 = vpop.f32.mrb[27].mxu0 }
 0x964   : > { %v1654_v29 = vpop.f32.mrb[28].mxu0 }
 0x965   : > { %v2495_v30 = vpop.f32.mrb[29].mxu0  ;;  %v1660_v31 = vsel %vm747_vm3, %v1654_v29, -inf }
 0x966   : > { %1661 = vmax.xlane.f32.xlu0 %v1660_v31  ;;  %v1657_v54 = vpop.f32.mrb[30].mxu0 }
 0x967   : > { %v2496_v32 = vpop.f32.mrb[31].mxu0 }
 0x96c   : > { %v1769_v25 = vpop.f32.mrb[32].mxu0 }
 0x96d   : > { %v2507_v33 = vpop.f32.mrb[33].mxu0  ;;  %v1775_v34 = vsel %vm747_vm3, %v1769_v25, -inf }
 0x96e   : > { %1776 = vmax.xlane.f32.xlu0 %v1775_v34  ;;  %v1772_v36 = vpop.f32.mrb[34].mxu0 }
 0x96f   : > { %v2508_v37 = vpop.f32.mrb[35].mxu0 }
 0x974   : > { %v1884_v39 = vpop.f32.mrb[36].mxu0 }
 0x975   : > { %v2519_v41 = vpop.f32.mrb[37].mxu0  ;;  %v1890_v43 = vsel %vm747_vm3, %v1884_v39, -inf }
 0x976   : > { %1891 = vmax.xlane.f32.xlu1 %v1890_v43  ;;  %v1887_v11 = vpop.f32.mrb[38].mxu0 }
 0x977   : > { %v2520_v45 = vpop.f32.mrb[39].mxu0 }
 0x9eb   : > { %v1550_v47 = vpop.xlane.xlu1 %1549 }
 0x9ec   : > { %v1551_v48 = vsub.f32 %v1542_v21, %v1550_v47 }
 0x9ee   : > { %v1552_v49 = vmul.f32 1.442695, %v1551_v48 }
 0x9f0   : > { %2607 = vpow2.f32 %v1552_v49 }
 0x9f3   : > { %v1662_v50 = vpop.xlane.xlu0 %1661 }
 0x9f4   : > { %v1663_v51 = vsub.f32 %v1654_v29, %v1662_v50 }
 0x9f6   : > { %v1664_v52 = vmul.f32 1.442695, %v1663_v51 }
 0x9f8   : > { %2609 = vpow2.f32 %v1664_v52 }
 0x9fa   : > { %v2608_v55 = vpop.eup %2607 }
 0x9fb   : > { %v1777_v56 = vpop.xlane.xlu0 %1776  ;;  %v1554_v57 = vsel %vm747_vm3, %v2608_v55, 0.0 }
 0x9fc   : > { %v1778_v58 = vsub.f32 %v1769_v25, %v1777_v56  ;;  %1555 = vadd.xlane.f32.xlu0 %v1554_v57 }
 0x9fe   : > { %v1779_v59 = vmul.f32 1.442695, %v1778_v58 }
 0xa00   : > { %2611 = vpow2.f32 %v1779_v59 }
 0xa02   : > { %v2610_v60 = vpop.eup %2609 }
 0xa03   : > { %v1666_v62 = vsel %vm747_vm3, %v2610_v60, 0.0  ;;  %v1892_v0 = vpop.xlane.xlu1 %1891 }
 0xa04   : > { %1667 = vadd.xlane.f32.xlu1 %v1666_v62  ;;  %v1893_v1 = vsub.f32 %v1884_v39, %v1892_v0 }
 0xa06   : > { %v1894_v2 = vmul.f32 1.442695, %v1893_v1 }
 0xa08   : > { %2613 = vpow2.f32 %v1894_v2 }
 0xa0a   : > { %v2612_v63 = vpop.eup %2611 }
 0xa0b   : > { %v1781_v19 = vsel %vm747_vm3, %v2612_v63, 0.0 }
 0xa0c   : > { %1782 = vadd.xlane.f32.xlu0 %v1781_v19 }
 0xa12   : > { %v2614_v3 = vpop.eup %2613 }
 0xa13   : > { %v1896_v4 = vsel %vm747_vm3, %v2614_v3, 0.0 }
 0xa15   : > { %1672 = vrot.lane.b32.xlu1 %v3017_v61, %s2646_s26  ;;  %s3198_s26 = scalar_lea.vmem %s3169_s12, %s2740_s15 }
 0xa22   : > { %1560 = vrot.lane.b32.xlu0 %v3017_v61, %s2647_s27 }
 0xa26   : > { %1902 = vrot.lane.b32.xlu0 %v3017_v61, %s2648_s19 }
 0xa39   : > { %1897 = vadd.xlane.f32.xlu1 %v1896_v4 }
 0xa4a   : > { %1787 = vrot.lane.b32.xlu1 %v3017_v61, %s3193_s4 }
 0xa89   : > { %v1556_v5 = vpop.xlane.xlu0 %1555 }
 0xa8a   : > { %2615 = vrcp.f32 %v1556_v5 }
 0xa91   : > { %v1668_v7 = vpop.xlane.xlu1 %1667 }
 0xa92   : > { %2617 = vrcp.f32 %v1668_v7 }
 0xa94   : > { %v2616_v8 = vpop.eup %2615 }
 0xa95   : > { %v1558_v14 = vmul.f32 %v2616_v8, %v2608_v55  ;;  %v1673_v20 = vpop.permute.xlu1 %1672 }
 0xa96   : > { %v1678_v23 = vsel %vm811_vm4, %v1673_v20, 0 }
 0xa97   : > { %v1559_v21 = vpack.c.bf16 %v1558_v14, %v1558_v14 }
 0xa99   : > { %v1783_v13 = vpop.xlane.xlu0 %1782 }
 0xa9a   : > { %2619 = vrcp.f32 %v1783_v13 }
 0xa9c   : > { %v2618_v22 = vpop.eup %2617 }
 0xa9d   : > { %v1561_v16 = vpop.permute.xlu0 %1560  ;;  %v1670_v61 = vmul.f32 %v2618_v22, %v2610_v60 }
 0xa9e   : > { %v1566_v17 = vsel %vm811_vm4, %v1561_v16, 0 }
 0xa9f   : > { %2486 = vmatpush3.bf16.msra.mxu1 %v1566_v17  ;;  %v1671_v53 = vpack.c.bf16 %v1670_v61, %v1670_v61 }
 0xaa0   : > { %2497 = vmatprep.subr.bf16.mxu1 %v2637_v10 }
 0xaa1   : > { %v1903_v32 = vpop.permute.xlu0 %1902 }
 0xaa2   : > { %2488 = vmatmul.mubr.msk.bf16.vlgmr.msra.gmra.mrb[28].mxu1 %vm747_vm3, %v1559_v21  ;;  %v1908_v33 = vsel %vm811_vm4, %v1903_v32, 0 }
 0xaa3   : > { %2498 = vmatpush3.bf16.msra.mxu1 %v1678_v23  ;;  %2499 = vmatprep.mubr.msk.bf16.mxu1 %vm2638_vm1, %v2637_v10 }
 0xaa4   : > { %2509 = vmatprep.subr.bf16.mxu1 %v2637_v10  ;;  %v2620_v24 = vpop.eup %2619 }
 0xaa5   : > { %v1785_v30 = vmul.f32 %v2620_v24, %v2612_v63 }
 0xaa7   : > { %v1786_v25 = vpack.c.bf16 %v1785_v30, %v1785_v30  ;;  %v677_v30 = vld [vmem:[%s3199_s2] sm:$0x1] }
 0xaaa   : > { %2500 = vmatmul.mubr.msk.bf16.vlgmr.msra.gmra.mrb[32].mxu1 %vm747_vm3, %v1671_v53 }
 0xaab   : > { %2511 = vmatprep.mubr.msk.bf16.mxu1 %vm2638_vm1, %v2637_v10 }
 0xac6   : > { %v1898_v29 = vpop.xlane.xlu1 %1897 }
 0xac7   : > { %2621 = vrcp.f32 %v1898_v29  ;;  %v675_v29 = vld [vmem:[%s3198_s26] sm:$0x1] }
 0xaca   : > { %v1788_v31 = vpop.permute.xlu1 %1787 }
 0xacb   : > { %v1793_v54 = vsel %vm811_vm4, %v1788_v31, 0  ;;  %v676_v31 = vunpack.c.l.bf16 %v675_v29 }
 0xacc   : > { %2510 = vmatpush3.bf16.msra.mxu1 %v1793_v54 }
 0xacd   : > { %2521 = vmatprep.subr.bf16.mxu1 %v2637_v10 }
 0xacf   : > { %2512 = vmatmul.mubr.msk.bf16.vlgmr.msra.gmra.mrb[36].mxu1 %vm747_vm3, %v1786_v25  ;;  %v678_v25 = vunpack.c.l.bf16 %v677_v30 }
 0xad0   : > { %2522 = vmatpush3.bf16.msra.mxu1 %v1908_v33  ;;  %2523 = vmatprep.mubr.msk.bf16.mxu1 %vm2638_vm1, %v2637_v10 }
 0xad1   : > { %v2622_v34 = vpop.eup %2621  ;;  %2535 = vmatprep.subr.bf16.mxu1 %v2637_v10 }
 0xad2   : > { %v1900_v36 = vmul.f32 %v2622_v34, %v2614_v3  ;;  %v1442_v34 = vrot.slane %v676_v31, %v2831_v18 }
 0xad4   : > { %v1901_v37 = vpack.c.bf16 %v1900_v36, %v1900_v36 }
 0xad7   : > { %2524 = vmatmul.mubr.msk.bf16.vlgmr.msra.gmra.mrb[40].mxu1 %vm747_vm3, %v1901_v37  ;;  %v1447_v37 = vrot.slane %v678_v25, %v2831_v18 }
 0xad8   : > { %2536 = vmatpush3.bf16.msra.mxu1 %v2939_v26  ;;  %2539 = vmatprep.mubr.msk.bf16.mxu1 %vm2638_vm1, %v2637_v10 }
 0xad9   : > { %2537 = vmatprep.subr.bf16.mxu1 %v2637_v10 }
 0xadc   : > { %2538 = vmatpush3.bf16.msra.mxu1 %v2944_v12 }
 0xb75   : > { %v1602_v39 = vpop.f32.mrb[28].mxu1 }
 0xb76   : > { %1608 = vst.msk [vmem:[#allocation3] sm:$0xff] %vm747_vm3, %v1602_v39  ;;  %v2489_v41 = vpop.f32.mrb[29].mxu1 }
 0xb77   : > { %v1605_v43 = vpop.f32.mrb[30].mxu1 }
 0xb78   : > { %v2490_v11 = vpop.f32.mrb[31].mxu1 }
 0xb7d   : > { %v1714_v45 = vpop.f32.mrb[32].mxu1 }
 0xb7e   : > { %1721 = vrot.lane.b32.xlu1 %v1714_v45, %s3194_s28  ;;  %v2501_v47 = vpop.f32.mrb[33].mxu1 }
 0xb7f   : > { %v1717_v48 = vpop.f32.mrb[34].mxu1 }
 0xb80   : > { %v2502_v49 = vpop.f32.mrb[35].mxu1 }
 0xba2   : > { %v1829_v26 = vpop.f32.mrb[36].mxu1 }
 0xba3   : > { %1836 = vrot.lane.b32.xlu0 %v1829_v26, %s3195_s29  ;;  %v2513_v50 = vpop.f32.mrb[37].mxu1 }
 0xba4   : > { %v1832_v51 = vpop.f32.mrb[38].mxu1 }
 0xba5   : > { %v2514_v52 = vpop.f32.mrb[39].mxu1 }
 0xbaa   : > { %v1944_v55 = vpop.f32.mrb[40].mxu1 }
 0xbab   : > { %1951 = vrot.lane.b32.xlu1 %v1944_v55, %s3196_s18  ;;  %v2525_v12 = vpop.f32.mrb[41].mxu1 }
 0xbac   : > { %v1947_v56 = vpop.f32.mrb[42].mxu1 }
 0xbad   : > { %v2526_v57 = vpop.f32.mrb[43].mxu1 }
 0xbf0   : > { %v1722_v58 = vpop.permute.xlu1 %1721 }
 0xbf1   : > { %1724 = vst.msk [vmem:[#allocation3] sm:$0xff] %vm971_vm5, %v1722_v58 }
 0xc15   : > { %v1837_v59 = vpop.permute.xlu0 %1836 }
 0xc16   : > { %1839 = vst.msk [vmem:[#allocation3] sm:$0xff] %vm1087_vm6, %v1837_v59 }
 0xc1d   : > { %v1952_v60 = vpop.permute.xlu1 %1951 }
 0xc1e   : > { %1954 = vst.msk [vmem:[#allocation3] sm:$0xff] %vm1203_vm7, %v1952_v60 }
 0xc25   : > { %v1955_v62 = vld [vmem:[#allocation3] sm:$0xff] }
 0xc26   : > { %v1956_v63 = vpack.c.bf16 %v1955_v62, %v1955_v62 }
 0xc28   : > { %2532 = vmatmul.mubr.msk.bf16.vlgmr.msra.gmra.mrb[40].mxu0 %vm697_vm2, %v1956_v63 }
 0xc29   : > { %2544 = vmatpush3.bf16.msra.mxu0 %v2949_v27  ;;  %2551 = vmatprep.mubr.msk.bf16.mxu0 %vm2638_vm1, %v2637_v10  ;;  %v673_v27 = vld [vmem:[%s3197_s23] sm:$0x1] }
 0xc2a   : > { %2545 = vmatprep.subr.bf16.mxu0 %v2637_v10  ;;  %v674_v19 = vunpack.c.l.bf16 %v673_v27 }
 0xc2c   : > { %v1356_v0 = vrot.slane %v674_v19, %v2831_v18 }
 0xc2d   : > { %2546 = vmatpush3.bf16.msra.mxu0 %v2953_v28 }
 0xc2e   : > { %2547 = vmatprep.subr.bf16.mxu0 %v2637_v10  ;;  %v1420_v2 = vadd.f32 %v3054_v15, %v1356_v0 }
 0xc30   : > { %v1425_v5 = vadd.f32 %v1420_v2, %v2976_v40 }
 0xc31   : > { %2548 = vmatpush3.bf16.msra.mxu0 %v2995_v9 }
 0xc32   : > { %2549 = vmatprep.subr.bf16.mxu0 %v2637_v10  ;;  %v1426_v7 = vsel %vm697_vm2, %v1425_v5, 0.0 }
 0xc35   : > { %2550 = vmatpush3.bf16.msra.mxu0 %v3000_v44 }
 0xcfb   : > { %v1994_v1 = vpop.f32.mrb[40].mxu0 }
 0xcfc   : > { %v1995_v28 = vadd.f32 %v1994_v1, %v2932_v6  ;;  %v2533_v3 = vpop.f32.mrb[41].mxu0 }
 0xcfd   : > { %v1997_v4 = vpop.f32.mrb[42].mxu0 }
 0xcfe   : > { %v2534_v9 = vpop.f32.mrb[43].mxu0  ;;  %v2000_v10 = vadd.f32 %v1995_v28, %v2984_v42 }
 0xd00   : > { %v2001_v44 = vsel %vm697_vm2, %v2000_v10, 0.0 }
 0xd01   : > { %2002 = vadd.xlane.f32.xlu0 %v2001_v44 }
 0xd05   : > { %1427 = vadd.xlane.f32.xlu0 %v1426_v7 }
 0xd8e   : > { %v2003_v8 = vpop.xlane.xlu0 %2002 }
 0xd8f   : > { %v2004_v13 = vmul.f32 0.03125, %v2003_v8 }
 0xd91   : > { %v2005_v14 = vsub.f32 %v2000_v10, %v2004_v13 }
 0xd92   : > { %v1428_v16 = vpop.xlane.xlu0 %1427 }
 0xd93   : > { %v1429_v15 = vmul.f32 0.03125, %v1428_v16  ;;  %v2006_v6 = vmul.f32 %v2005_v14, %v2005_v14 }
 0xd95   : > { %v1430_v17 = vsub.f32 %v1425_v5, %v1429_v15  ;;  %v2007_v20 = vsel %vm697_vm2, %v2006_v6, 0.0 }
 0xd96   : > { %2008 = vadd.xlane.f32.xlu1 %v2007_v20 }
 0xd97   : > { %v1431_v42 = vmul.f32 %v1430_v17, %v1430_v17 }
 0xd99   : > { %v1432_v21 = vsel %vm697_vm2, %v1431_v42, 0.0 }
 0xd9a   : > { %1433 = vadd.xlane.f32.xlu1 %v1432_v21 }
 0xe23   : > { %v2009_v40 = vpop.xlane.xlu1 %2008 }
 0xe24   : > { %v2010_v22 = vmul.f32 0.03125, %v2009_v40 }
 0xe26   : > { %v2011_v23 = vadd.f32 1e-05, %v2010_v22 }
 0xe27   : > { %v1434_v61 = vpop.xlane.xlu1 %1433 }
 0xe28   : > { %2623 = vrsqrt.f32 %v2011_v23  ;;  %v1435_v53 = vmul.f32 0.03125, %v1434_v61 }
 0xe2a   : > { %v1436_v24 = vadd.f32 1e-05, %v1435_v53 }
 0xe2c   : > { %2625 = vrsqrt.f32 %v1436_v24 }
 0xe32   : > { %v2624_v54 = vpop.eup %2623 }
 0xe33   : > { %v2013_v32 = vmul.f32 %v2624_v54, %v2005_v14 }
 0xe35   : > { %v2014_v33 = vmul.f32 %v2013_v32, %v2969_v35 }
 0xe36   : > { %v2626_v36 = vpop.eup %2625 }
 0xe37   : > { %v1438_v39 = vmul.f32 %v2626_v36, %v1430_v17  ;;  %v2015_v41 = vadd.f32 %v2014_v33, %v2972_v38 }
 0xe39   : > { %v1443_v43 = vmul.f32 %v1442_v34, %v1438_v39  ;;  %v2016_v11 = vpack.c.bf16 %v2015_v41, %v2015_v41 }
 0xe3b   : > { %v1448_v45 = vadd.f32 %v1447_v37, %v1443_v43  ;;  %2540 = vmatmul.mubr.msk.bf16.vlgmr.msra.gmra.mrb[44].mxu1 %vm697_vm2, %v2016_v11 }
 0xe3d   : > { %1449 = vst.msk [vmem:[#allocation2] sm:$0xff] %vm697_vm2, %v1448_v45 }
 0xe44   : > { %v2126_v3 = vld [vmem:[#allocation2] sm:$0xff] (!%p2316_p5) }
 0xe45   : > { %v2128_v9 = vpack.c.bf16 (!%p2316_p5), %v2126_v3, %v2126_v3 }
 0xe47   : > { %2131 = vst.msk [vmem:[%s3200_s20] sm:$0xf] (!%p2316_p5), %vm2130_vm9, %v2128_v9 }
 0xf0e   : > { %v2054_v47 = vpop.f32.mrb[44].mxu1 }
 0xf0f   : > { %v2055_v48 = vadd.f32 %v2054_v47, %v3010_v46  ;;  %v2541_v49 = vpop.f32.mrb[45].mxu1 }
 0xf10   : > { %v2057_v35 = vpop.f32.mrb[46].mxu1 }
 0xf11   : > { %v2060_v26 = vmax.f32 %v2055_v48, 0.0  ;;  %v2542_v50 = vpop.f32.mrb[47].mxu1 }
 0xf13   : > { %v2061_v51 = vpack.c.bf16 %v2060_v26, %v2060_v26 }
 0xf15   : > { %2552 = vmatmul.mubr.msk.bf16.vlgmr.msra.gmra.mrb[44].mxu0 %vm1381_vm8, %v2061_v51 }
 0xfe8   : > { %v2099_v18 = vpop.f32.mrb[44].mxu0 }
 0xfe9   : > { %v2100_v52 = vadd.f32 %v2099_v18, %v1356_v0  ;;  %v2553_v38 = vpop.f32.mrb[45].mxu0 }
 0xfea   : > { %v2102_v55 = vpop.f32.mrb[46].mxu0 }
 0xfeb   : > { %v2554_v12 = vpop.f32.mrb[47].mxu0  ;;  %v2105_v56 = vadd.f32 %v2100_v52, %v2015_v41 }
 0xfed   : > { %v2106_v57 = vsel %vm697_vm2, %v2105_v56, 0.0 }
 0xfee   : > { %2107 = vadd.xlane.f32.xlu0 %v2106_v57 }
0x107b   : > { %v2108_v58 = vpop.xlane.xlu0 %2107 }
0x107c   : > { %v2109_v59 = vmul.f32 0.03125, %v2108_v58 }
0x107e   : > { %v2110_v60 = vsub.f32 %v2105_v56, %v2109_v59 }
0x1080   : > { %v2111_v46 = vmul.f32 %v2110_v60, %v2110_v60 }
0x1082   : > { %v2112_v62 = vsel %vm697_vm2, %v2111_v46, 0.0 }
0x1083   : > { %2113 = vadd.xlane.f32.xlu0 %v2112_v62 }
0x1110   : > { %v2114_v63 = vpop.xlane.xlu0 %2113 }
0x1111   : > { %v2115_v27 = vmul.f32 0.03125, %v2114_v63 }
0x1113   : > { %v2116_v19 = vadd.f32 1e-05, %v2115_v27 }
0x1115   : > { %2627 = vrsqrt.f32 %v2116_v19 }
0x111f   : > { %v2628_v1 = vpop.eup %2627 }
0x1120   : > { %v2118_v0 = vmul.f32 %v2628_v1, %v2110_v60  ;;  %2125 = sbr.rel (%p2316_p5) target bundleno = 4401 (0x1131), region = 84 }
0x1122   : > { %v2119_v2 = vmul.f32 %v2118_v0, %v1442_v34 }
0x1124   : > { %v2120_v28 = vadd.f32 %v2119_v2, %v1447_v37 }
0x1126   : > { %2121 = vst.msk [vmem:[#allocation2 + $0x8] sm:$0xff] %vm697_vm2, %v2120_v28 }
0x112d   : > { %v2127_v4 = vld [vmem:[#allocation2 + $0x8] sm:$0xff] }
0x112e   : > { %v2129_v10 = vpack.c.bf16 %v2127_v4, %v2127_v4 }
0x1130   : > { %2132 = vst.msk [vmem:[%s3200_s20 + $0x4] sm:$0xf] %vm2130_vm9, %v2129_v10 }
0x1131 PF: > { %s3201_s22 = sld [smem:[#allocation4_spill]] }
0x1137   : > { %s24_s29 = sadd.s32 1, %s3201_s22  }
0x1138   : > { %p21_p6 = scmp.ge.s32.totalorder %s24_s29, 4  }
0x113a   :  { %23 = sbr.rel (!%p21_p6) target bundleno = 5 (0x5), region = 144 }

</bundles_post_ra>
